<compile_context>
chip_gen: v6e
topology: v6e:2x2x1
jax: 0.10.0
libtpu: 0.0.40
codegen_flags: <defaults>
</compile_context>

<pallas_src>
import math
from functools import partial

import jax
import jax.numpy as jnp
from jax import lax
from jax.experimental import pallas as pl
from jax.experimental.pallas import tpu as pltpu


def _torgb_fused_kernel(x_ref, s_ref, w1_ref, b1_ref, w2_ref, b2_ref,
                        wconv_ref, bias_ref, mask_ref, o_ref,
                        *, H, W, K, Cin, eps):
    """NB batch elements: modulate -> KxK 'same' conv -> instance norm -> + bias.

    Layout: channels on sublanes, flattened pixels (P = H*W) on lanes.
      x_ref/s_ref : (NB, Cin, P)   (f32 or bf16)   o_ref : (NB, Cout, P) f32
      w1   : (2*hidden, Cin)        b1 : (2*hidden, 1)    gamma||beta layer 1
      w2   : (2*Cin, 2*hidden) blkdiag  b2 : (2*Cin, 1)   gamma||beta layer 2
      wconv: (K*K, Cout, Cin)       bias : (Cout, 1)
      mask : (max(K*K,1), P)  per-tap in-image mask (dummy ones when K == 1)
    """
    P = H * W
    pad = K // 2
    NB = x_ref.shape[0]
    Cout = o_ref.shape[1]

    masks = mask_ref[...] if K > 1 else None        # hoisted constant, loaded once

    for b in range(NB):                              # static unroll (NB is small)
        x = x_ref[b].astype(jnp.float32)             # (Cin, P)
        s = s_ref[b].astype(jnp.float32)             # (Cin, P)

        # ---- spatial modulation: gamma/beta = EqualConv1x1(relu(EqualConv1x1)) ----
        # layer-1 of gamma & beta fused in one matmul; layer-2 fused as one
        # block-diagonal matmul (contraction depth 2*hidden).
        h1 = jnp.maximum(
            jnp.dot(w1_ref[...], s, preferred_element_type=jnp.float32)
            + b1_ref[...], 0.0)                                        # (2*hidden, P)
        gb = jnp.dot(w2_ref[...], h1,
                     preferred_element_type=jnp.float32) + b2_ref[...]  # (2*Cin, P)
        xm = gb[:Cin] * x + gb[Cin:]                                   # (Cin, P)

        # ---- KxK "same" conv ----
        if K == 1:
            # ToRGB fast path: single 1x1 tap -> straight to the matmul.
            acc = jnp.dot(wconv_ref[0], xm, preferred_element_type=jnp.float32)
        else:
            # Lane-rolled taps (XLU) + hoisted edge masks; no padded scratch.
            acc = jnp.zeros((Cout, P), jnp.float32)
            for kh in range(K):
                for kw in range(K):
                    idx = kh * K + kw
                    d = (kh - pad) * W + (kw - pad)
                    if d == 0:
                        tap = xm
                    else:
                        tap = pltpu.roll(xm, (-d) % P, axis=1) * masks[idx:idx + 1]
                    acc = acc + jnp.dot(wconv_ref[idx], tap,
                                        preferred_element_type=jnp.float32)

        # ---- instance norm (unbiased var, eps inside sqrt) + ToRGB bias ----
        # sum / sum-of-squares reduces + one fused FMA output pass.
        # (If tolerances ever tighten, switch back to the centered two-pass var.)
        ssum = jnp.sum(acc, axis=1, keepdims=True)                     # (Cout, 1)
        ssq = jnp.sum(acc * acc, axis=1, keepdims=True)                # (Cout, 1)
        mean = ssum * (1.0 / P)
        var = (ssq - ssum * mean) / (P - 1)
        inv = lax.rsqrt(var + eps)
        o_ref[b] = (acc * inv + (bias_ref[...] - mean * inv)).astype(o_ref.dtype)


def torgb_spatial_forward(x_nchw, style_nchw, params, kernel_size,
                          io_dtype=jnp.bfloat16):
    """ToRGB(spatial=True).forward(input, style, skip=None) in NCHW."""
    N, Cin, H, W = x_nchw.shape
    Cout = params["weight"].shape[0]
    K = kernel_size
    pad = K // 2
    P = H * W
    hidden = params["g1_w"].shape[0]
    assert P % 128 == 0, "H*W must be a multiple of 128 (TPU lane width)"

    # Free reshapes (no transpose): pixels land on TPU lanes.  Streamed inputs
    # may be bf16 (halves HBM bytes / VMEM); all in-kernel math stays f32.
    x3 = x_nchw.reshape(N, Cin, P).astype(io_dtype)
    s3 = style_nchw.reshape(N, Cin, P).astype(io_dtype)

    # Fold the EqualConv2d equalized-lr scales into the resident f32 weights.
    s1 = 1.0 / math.sqrt(Cin)
    s2 = 1.0 / math.sqrt(hidden)
    # gamma/beta first layers fused into one (2*hidden, Cin) matmul.
    w1 = (jnp.concatenate([params["g1_w"], params["b1_w"]], axis=0)
          .astype(jnp.float32) * s1)                                        # (2H, Cin)
    b1 = jnp.concatenate([params["g1_b"], params["b1_b"]],
                         axis=0)[:, None].astype(jnp.float32)               # (2H, 1)
    # gamma/beta second layers fused into one block-diagonal matmul.
    w2 = jnp.zeros((2 * Cin, 2 * hidden), jnp.float32)
    w2 = w2.at[:Cin, :hidden].set(params["g2_w"].astype(jnp.float32) * s2)
    w2 = w2.at[Cin:, hidden:].set(params["b2_w"].astype(jnp.float32) * s2)  # (2Cin, 2H)
    b2 = jnp.concatenate([params["g2_b"], params["b2_b"]],
                         axis=0)[:, None].astype(jnp.float32)               # (2Cin, 1)

    conv_scale = 1.0 / math.sqrt(Cin * K * K)
    wconv = jnp.transpose(params["weight"].astype(jnp.float32) * conv_scale,
                          (2, 3, 0, 1)).reshape(K * K, Cout, Cin)           # (K*K,Cout,Cin)
    rgb_bias = params["rgb_bias"].reshape(Cout, 1).astype(jnp.float32)

    # Hoisted per-tap in-image masks (constant across the grid); dummy for K==1.
    if K > 1:
        pos = jnp.arange(P, dtype=jnp.int32)
        hh, ww = pos // W, pos % W
        rows = []
        for kh in range(K):
            for kw in range(K):
                dy, dx = kh - pad, kw - pad
                rows.append(((hh + dy >= 0) & (hh + dy < H) &
                             (ww + dx >= 0) & (ww + dx < W)).astype(jnp.float32))
        mask = jnp.stack(rows, axis=0)                                      # (K*K, P)
    else:
        mask = jnp.ones((1, P), jnp.float32)
    nmask = mask.shape[0]

    # Small-image regime: fatten the grid step (whole batch per step) so the
    # per-step overhead and tiny matmul latencies amortize; large images keep
    # one image per step so VMEM stays bounded.
    NB = N if P <= 64 * 64 else 1
    grid = (N // NB,)

    kernel = partial(_torgb_fused_kernel, H=H, W=W, K=K, Cin=Cin, eps=1e-5)

    out3 = pl.pallas_call(
        kernel,
        out_shape=jax.ShapeDtypeStruct((N, Cout, P), jnp.float32),
        grid=grid,
        in_specs=[
            pl.BlockSpec((NB, Cin, P), lambda n: (n, 0, 0)),        # x      (streamed)
            pl.BlockSpec((NB, Cin, P), lambda n: (n, 0, 0)),        # style  (streamed)
            pl.BlockSpec((2 * hidden, Cin), lambda n: (0, 0)),      # w1     (resident)
            pl.BlockSpec((2 * hidden, 1), lambda n: (0, 0)),        # b1
            pl.BlockSpec((2 * Cin, 2 * hidden), lambda n: (0, 0)),  # w2 block-diag
            pl.BlockSpec((2 * Cin, 1), lambda n: (0, 0)),           # b2
            pl.BlockSpec((K * K, Cout, Cin), lambda n: (0, 0, 0)),  # conv weight
            pl.BlockSpec((Cout, 1), lambda n: (0, 0)),              # ToRGB bias
            pl.BlockSpec((nmask, P), lambda n: (0, 0)),             # tap masks
        ],
        out_specs=pl.BlockSpec((NB, Cout, P), lambda n: (n, 0, 0)),
        compiler_params=pltpu.CompilerParams(
            dimension_semantics=("parallel",),          # batch -> pipelined / megacore
            vmem_limit_bytes=32 * 1024 * 1024),         # explicit; well under v7x 64 MiB
    )(x3, s3, w1, b1, w2, b2, wconv, rgb_bias, mask)

    return out3.reshape(N, Cout, H, W)


# -----------------------------------------------------------------------------
# Pure-JAX reference (mirrors the PyTorch forward) for correctness checking.
# -----------------------------------------------------------------------------
def reference_forward(x, style, params, K):
    N, Cin, H, W = x.shape
    Cout = params["weight"].shape[0]
    hidden = params["g1_w"].shape[0]
    s1 = 1.0 / math.sqrt(Cin)
    s2 = 1.0 / math.sqrt(hidden)

    def c1x1(t, w, b):  # NCHW 1x1 conv
        return jnp.einsum('nchw,oc->nohw', t, w,
                          precision=lax.Precision.HIGHEST) + b[None, :, None, None]

    g = jnp.maximum(c1x1(style, params["g1_w"] * s1, params["g1_b"]), 0.0)
    gamma = c1x1(g, params["g2_w"] * s2, params["g2_b"])
    bh = jnp.maximum(c1x1(style, params["b1_w"] * s1, params["b1_b"]), 0.0)
    beta = c1x1(bh, params["b2_w"] * s2, params["b2_b"])
    xm = gamma * x + beta

    scale = 1.0 / math.sqrt(Cin * K * K)
    out = lax.conv_general_dilated(
        xm, params["weight"] * scale, window_strides=(1, 1),
        padding=[(K // 2, K // 2)] * 2,
        dimension_numbers=('NCHW', 'OIHW', 'NCHW'),
        precision=lax.Precision.HIGHEST)

    flat = out.reshape(N, Cout, -1)
    mean = flat.mean(-1)[:, :, None, None]
    var = flat.var(-1, ddof=1)[:, :, None, None] + 1e-5
    out = (out - mean) / jnp.sqrt(var)
    return out + params["rgb_bias"].reshape(1, Cout, 1, 1)


if __name__ == "__main__":
    def make_case(N, Cin, Cout, K, H, W, hidden):
        key = jax.random.PRNGKey(0)
        ks = jax.random.split(key, 12)
        params = {
            "weight": jax.random.normal(ks[0], (Cout, Cin, K, K), jnp.float32),
            "g1_w": jax.random.normal(ks[1], (hidden, Cin), jnp.float32),
            "g1_b": 0.1 * jax.random.normal(ks[2], (hidden,), jnp.float32),
            "g2_w": jax.random.normal(ks[3], (Cin, hidden), jnp.float32),
            "g2_b": 0.1 * jax.random.normal(ks[4], (Cin,), jnp.float32),
            "b1_w": jax.random.normal(ks[5], (hidden, Cin), jnp.float32),
            "b1_b": 0.1 * jax.random.normal(ks[6], (hidden,), jnp.float32),
            "b2_w": jax.random.normal(ks[7], (Cin, hidden), jnp.float32),
            "b2_b": 0.1 * jax.random.normal(ks[8], (Cin,), jnp.float32),
            "rgb_bias": 0.1 * jax.random.normal(ks[9], (Cout,), jnp.float32),
        }
        x = jax.random.normal(ks[10], (N, Cin, H, W), jnp.float32)
        style = jax.random.normal(ks[11], (N, Cin, H, W), jnp.float32)
        return params, x, style

    def check(out, ref, shape, tol):
        assert out.shape == shape, out.shape
        assert bool(jnp.allclose(out, ref, atol=tol, rtol=tol)), (
            f"max abs err {float(jnp.max(jnp.abs(out - ref)))}")

    # 1) General SpatiallyModulatedConv2d path (K=3, Cout=8), f32 I/O, strict tol.
    params, x, style = make_case(N=2, Cin=4, Cout=8, K=3, H=16, W=16, hidden=128)
    out = jax.block_until_ready(
        torgb_spatial_forward(x, style, params, 3, io_dtype=jnp.float32))
    check(out, reference_forward(x, style, params, 3), (2, 8, 16, 16), 2e-3)

    # 2) ToRGB configuration (K=1, Cout=3 fast path), f32 I/O, strict tol.
    params, x, style = make_case(N=2, Cin=4, Cout=3, K=1, H=16, W=16, hidden=128)
    out = jax.block_until_ready(
        torgb_spatial_forward(x, style, params, 1, io_dtype=jnp.float32))
    check(out, reference_forward(x, style, params, 1), (2, 3, 16, 16), 2e-3)

    # 3) ToRGB configuration with bf16 streamed inputs (production default);
    #    compare against the reference fed the same bf16-rounded inputs.
    out = jax.block_until_ready(
        torgb_spatial_forward(x, style, params, 1, io_dtype=jnp.bfloat16))
    xr = x.astype(jnp.bfloat16).astype(jnp.float32)
    sr = style.astype(jnp.bfloat16).astype(jnp.float32)
    check(out, reference_forward(xr, sr, params, 1), (2, 3, 16, 16), 2e-3)

    print("KERNEL_OK")
</pallas_src>

<mosaic_0001>
module attributes {stable_mosaic.version = 11 : i64} {
  func.func @_torgb_fused_kernel(%arg0: i32, %arg1: memref<2x4x256xf32, #tpu.memory_space<vmem>>, %arg2: memref<2x4x256xf32, #tpu.memory_space<vmem>>, %arg3: memref<256x4xf32, #tpu.memory_space<vmem>>, %arg4: memref<256x1xf32, #tpu.memory_space<vmem>>, %arg5: memref<8x256xf32, #tpu.memory_space<vmem>>, %arg6: memref<8x1xf32, #tpu.memory_space<vmem>>, %arg7: memref<9x8x4xf32, #tpu.memory_space<vmem>>, %arg8: memref<8x1xf32, #tpu.memory_space<vmem>>, %arg9: memref<9x256xf32, #tpu.memory_space<vmem>>, %arg10: memref<2x8x256xf32, #tpu.memory_space<vmem>>) attributes {dimension_semantics = [#tpu.dimension_semantics<parallel>], iteration_bounds = array<i64: 1>, scalar_prefetch = 0 : i64, scratch_operands = 0 : i64, tpu.core_type = #tpu.core_type<tc>, window_params = [{transform_indices = @transform_0, window_bounds = array<i64: 2, 4, 256>}, {transform_indices = @transform_1, window_bounds = array<i64: 2, 4, 256>}, {pipeline_mode = #tpu.pipeline_mode<synchronous>, transform_indices = @transform_2, window_bounds = array<i64: 256, 4>}, {pipeline_mode = #tpu.pipeline_mode<synchronous>, transform_indices = @transform_3, window_bounds = array<i64: 256, 1>}, {pipeline_mode = #tpu.pipeline_mode<synchronous>, transform_indices = @transform_4, window_bounds = array<i64: 8, 256>}, {pipeline_mode = #tpu.pipeline_mode<synchronous>, transform_indices = @transform_5, window_bounds = array<i64: 8, 1>}, {pipeline_mode = #tpu.pipeline_mode<synchronous>, transform_indices = @transform_6, window_bounds = array<i64: 9, 8, 4>}, {pipeline_mode = #tpu.pipeline_mode<synchronous>, transform_indices = @transform_7, window_bounds = array<i64: 8, 1>}, {pipeline_mode = #tpu.pipeline_mode<synchronous>, transform_indices = @transform_8, window_bounds = array<i64: 9, 256>}, {transform_indices = @transform_9, window_bounds = array<i64: 2, 8, 256>}]} {
    %c0 = arith.constant 0 : index
    %c0_0 = arith.constant 0 : index
    %0 = vector.load %arg9[%c0, %c0_0] : memref<9x256xf32, #tpu.memory_space<vmem>>, vector<9x256xf32>
    %c0_1 = arith.constant 0 : index
    %c0_2 = arith.constant 0 : index
    %c0_3 = arith.constant 0 : index
    %1 = vector.load %arg1[%c0_1, %c0_2, %c0_3] : memref<2x4x256xf32, #tpu.memory_space<vmem>>, vector<1x4x256xf32>
    %2 = vector.shape_cast %1 : vector<1x4x256xf32> to vector<4x256xf32>
    %c0_4 = arith.constant 0 : index
    %c0_5 = arith.constant 0 : index
    %c0_6 = arith.constant 0 : index
    %3 = vector.load %arg2[%c0_4, %c0_5, %c0_6] : memref<2x4x256xf32, #tpu.memory_space<vmem>>, vector<1x4x256xf32>
    %4 = vector.shape_cast %3 : vector<1x4x256xf32> to vector<4x256xf32>
    %c0_7 = arith.constant 0 : index
    %c0_8 = arith.constant 0 : index
    %5 = vector.load %arg3[%c0_7, %c0_8] : memref<256x4xf32, #tpu.memory_space<vmem>>, vector<256x4xf32>
    %cst = arith.constant dense<0.000000e+00> : vector<256x256xf32>
    %6 = tpu.matmul %5, %4, %cst {dimension_numbers = #tpu.dot_dimension_numbers<[1], [0], [0], [1], [0, 0, 1, 1], [], []>} : vector<256x4xf32>, vector<4x256xf32>, vector<256x256xf32> -> vector<256x256xf32>
    %c0_9 = arith.constant 0 : index
    %c0_10 = arith.constant 0 : index
    %7 = vector.load %arg4[%c0_9, %c0_10] : memref<256x1xf32, #tpu.memory_space<vmem>>, vector<256x1xf32>
    %8 = vector.broadcast %7 : vector<256x1xf32> to vector<256x256xf32>
    %9 = arith.addf %6, %8 : vector<256x256xf32>
    %cst_11 = arith.constant 0.000000e+00 : f32
    %10 = vector.broadcast %cst_11 : f32 to vector<256x256xf32>
    %11 = arith.maximumf %9, %10 : vector<256x256xf32>
    %c0_12 = arith.constant 0 : index
    %c0_13 = arith.constant 0 : index
    %12 = vector.load %arg5[%c0_12, %c0_13] : memref<8x256xf32, #tpu.memory_space<vmem>>, vector<8x256xf32>
    %cst_14 = arith.constant dense<0.000000e+00> : vector<8x256xf32>
    %13 = tpu.matmul %12, %11, %cst_14 {dimension_numbers = #tpu.dot_dimension_numbers<[1], [0], [0], [1], [0, 0, 1, 1], [], []>} : vector<8x256xf32>, vector<256x256xf32>, vector<8x256xf32> -> vector<8x256xf32>
    %c0_15 = arith.constant 0 : index
    %c0_16 = arith.constant 0 : index
    %14 = vector.load %arg6[%c0_15, %c0_16] : memref<8x1xf32, #tpu.memory_space<vmem>>, vector<8x1xf32>
    %15 = vector.broadcast %14 : vector<8x1xf32> to vector<8x256xf32>
    %16 = arith.addf %13, %15 : vector<8x256xf32>
    %17 = vector.extract_strided_slice %16 {offsets = [0, 0], sizes = [4, 256], strides = [1, 1]} : vector<8x256xf32> to vector<4x256xf32>
    %18 = arith.mulf %17, %2 : vector<4x256xf32>
    %19 = vector.extract_strided_slice %16 {offsets = [4, 0], sizes = [4, 256], strides = [1, 1]} : vector<8x256xf32> to vector<4x256xf32>
    %20 = arith.addf %18, %19 : vector<4x256xf32>
    %cst_17 = arith.constant 0.000000e+00 : f32
    %21 = vector.broadcast %cst_17 : f32 to vector<8x256xf32>
    %c17_i32 = arith.constant 17 : i32
    %22 = tpu.dynamic_rotate %20 by %c17_i32 dim 1 : vector<4x256xf32>, i32 -> vector<4x256xf32>
    %23 = vector.extract_strided_slice %0 {offsets = [0, 0], sizes = [1, 256], strides = [1, 1]} : vector<9x256xf32> to vector<1x256xf32>
    %24 = vector.broadcast %23 : vector<1x256xf32> to vector<4x256xf32>
    %25 = arith.mulf %22, %24 : vector<4x256xf32>
    %c0_18 = arith.constant 0 : index
    %c0_19 = arith.constant 0 : index
    %c0_20 = arith.constant 0 : index
    %26 = vector.load %arg7[%c0_18, %c0_19, %c0_20] : memref<9x8x4xf32, #tpu.memory_space<vmem>>, vector<1x8x4xf32>
    %27 = vector.shape_cast %26 : vector<1x8x4xf32> to vector<8x4xf32>
    %cst_21 = arith.constant dense<0.000000e+00> : vector<8x256xf32>
    %28 = tpu.matmul %27, %25, %cst_21 {dimension_numbers = #tpu.dot_dimension_numbers<[1], [0], [0], [1], [0, 0, 1, 1], [], []>} : vector<8x4xf32>, vector<4x256xf32>, vector<8x256xf32> -> vector<8x256xf32>
    %29 = arith.addf %21, %28 : vector<8x256xf32>
    %c16_i32 = arith.constant 16 : i32
    %30 = tpu.dynamic_rotate %20 by %c16_i32 dim 1 : vector<4x256xf32>, i32 -> vector<4x256xf32>
    %31 = vector.extract_strided_slice %0 {offsets = [1, 0], sizes = [1, 256], strides = [1, 1]} : vector<9x256xf32> to vector<1x256xf32>
    %32 = vector.broadcast %31 : vector<1x256xf32> to vector<4x256xf32>
    %33 = arith.mulf %30, %32 : vector<4x256xf32>
    %c1 = arith.constant 1 : index
    %c0_22 = arith.constant 0 : index
    %c0_23 = arith.constant 0 : index
    %34 = vector.load %arg7[%c1, %c0_22, %c0_23] : memref<9x8x4xf32, #tpu.memory_space<vmem>>, vector<1x8x4xf32>
    %35 = vector.shape_cast %34 : vector<1x8x4xf32> to vector<8x4xf32>
    %cst_24 = arith.constant dense<0.000000e+00> : vector<8x256xf32>
    %36 = tpu.matmul %35, %33, %cst_24 {dimension_numbers = #tpu.dot_dimension_numbers<[1], [0], [0], [1], [0, 0, 1, 1], [], []>} : vector<8x4xf32>, vector<4x256xf32>, vector<8x256xf32> -> vector<8x256xf32>
    %37 = arith.addf %29, %36 : vector<8x256xf32>
    %c15_i32 = arith.constant 15 : i32
    %38 = tpu.dynamic_rotate %20 by %c15_i32 dim 1 : vector<4x256xf32>, i32 -> vector<4x256xf32>
    %39 = vector.extract_strided_slice %0 {offsets = [2, 0], sizes = [1, 256], strides = [1, 1]} : vector<9x256xf32> to vector<1x256xf32>
    %40 = vector.broadcast %39 : vector<1x256xf32> to vector<4x256xf32>
    %41 = arith.mulf %38, %40 : vector<4x256xf32>
    %c2 = arith.constant 2 : index
    %c0_25 = arith.constant 0 : index
    %c0_26 = arith.constant 0 : index
    %42 = vector.load %arg7[%c2, %c0_25, %c0_26] : memref<9x8x4xf32, #tpu.memory_space<vmem>>, vector<1x8x4xf32>
    %43 = vector.shape_cast %42 : vector<1x8x4xf32> to vector<8x4xf32>
    %cst_27 = arith.constant dense<0.000000e+00> : vector<8x256xf32>
    %44 = tpu.matmul %43, %41, %cst_27 {dimension_numbers = #tpu.dot_dimension_numbers<[1], [0], [0], [1], [0, 0, 1, 1], [], []>} : vector<8x4xf32>, vector<4x256xf32>, vector<8x256xf32> -> vector<8x256xf32>
    %45 = arith.addf %37, %44 : vector<8x256xf32>
    %c1_i32 = arith.constant 1 : i32
    %46 = tpu.dynamic_rotate %20 by %c1_i32 dim 1 : vector<4x256xf32>, i32 -> vector<4x256xf32>
    %47 = vector.extract_strided_slice %0 {offsets = [3, 0], sizes = [1, 256], strides = [1, 1]} : vector<9x256xf32> to vector<1x256xf32>
    %48 = vector.broadcast %47 : vector<1x256xf32> to vector<4x256xf32>
    %49 = arith.mulf %46, %48 : vector<4x256xf32>
    %c3 = arith.constant 3 : index
    %c0_28 = arith.constant 0 : index
    %c0_29 = arith.constant 0 : index
    %50 = vector.load %arg7[%c3, %c0_28, %c0_29] : memref<9x8x4xf32, #tpu.memory_space<vmem>>, vector<1x8x4xf32>
    %51 = vector.shape_cast %50 : vector<1x8x4xf32> to vector<8x4xf32>
    %cst_30 = arith.constant dense<0.000000e+00> : vector<8x256xf32>
    %52 = tpu.matmul %51, %49, %cst_30 {dimension_numbers = #tpu.dot_dimension_numbers<[1], [0], [0], [1], [0, 0, 1, 1], [], []>} : vector<8x4xf32>, vector<4x256xf32>, vector<8x256xf32> -> vector<8x256xf32>
    %53 = arith.addf %45, %52 : vector<8x256xf32>
    %c4 = arith.constant 4 : index
    %c0_31 = arith.constant 0 : index
    %c0_32 = arith.constant 0 : index
    %54 = vector.load %arg7[%c4, %c0_31, %c0_32] : memref<9x8x4xf32, #tpu.memory_space<vmem>>, vector<1x8x4xf32>
    %55 = vector.shape_cast %54 : vector<1x8x4xf32> to vector<8x4xf32>
    %cst_33 = arith.constant dense<0.000000e+00> : vector<8x256xf32>
    %56 = tpu.matmul %55, %20, %cst_33 {dimension_numbers = #tpu.dot_dimension_numbers<[1], [0], [0], [1], [0, 0, 1, 1], [], []>} : vector<8x4xf32>, vector<4x256xf32>, vector<8x256xf32> -> vector<8x256xf32>
    %57 = arith.addf %53, %56 : vector<8x256xf32>
    %c255_i32 = arith.constant 255 : i32
    %58 = tpu.dynamic_rotate %20 by %c255_i32 dim 1 : vector<4x256xf32>, i32 -> vector<4x256xf32>
    %59 = vector.extract_strided_slice %0 {offsets = [5, 0], sizes = [1, 256], strides = [1, 1]} : vector<9x256xf32> to vector<1x256xf32>
    %60 = vector.broadcast %59 : vector<1x256xf32> to vector<4x256xf32>
    %61 = arith.mulf %58, %60 : vector<4x256xf32>
    %c5 = arith.constant 5 : index
    %c0_34 = arith.constant 0 : index
    %c0_35 = arith.constant 0 : index
    %62 = vector.load %arg7[%c5, %c0_34, %c0_35] : memref<9x8x4xf32, #tpu.memory_space<vmem>>, vector<1x8x4xf32>
    %63 = vector.shape_cast %62 : vector<1x8x4xf32> to vector<8x4xf32>
    %cst_36 = arith.constant dense<0.000000e+00> : vector<8x256xf32>
    %64 = tpu.matmul %63, %61, %cst_36 {dimension_numbers = #tpu.dot_dimension_numbers<[1], [0], [0], [1], [0, 0, 1, 1], [], []>} : vector<8x4xf32>, vector<4x256xf32>, vector<8x256xf32> -> vector<8x256xf32>
    %65 = arith.addf %57, %64 : vector<8x256xf32>
    %c241_i32 = arith.constant 241 : i32
    %66 = tpu.dynamic_rotate %20 by %c241_i32 dim 1 : vector<4x256xf32>, i32 -> vector<4x256xf32>
    %67 = vector.extract_strided_slice %0 {offsets = [6, 0], sizes = [1, 256], strides = [1, 1]} : vector<9x256xf32> to vector<1x256xf32>
    %68 = vector.broadcast %67 : vector<1x256xf32> to vector<4x256xf32>
    %69 = arith.mulf %66, %68 : vector<4x256xf32>
    %c6 = arith.constant 6 : index
    %c0_37 = arith.constant 0 : index
    %c0_38 = arith.constant 0 : index
    %70 = vector.load %arg7[%c6, %c0_37, %c0_38] : memref<9x8x4xf32, #tpu.memory_space<vmem>>, vector<1x8x4xf32>
    %71 = vector.shape_cast %70 : vector<1x8x4xf32> to vector<8x4xf32>
    %cst_39 = arith.constant dense<0.000000e+00> : vector<8x256xf32>
    %72 = tpu.matmul %71, %69, %cst_39 {dimension_numbers = #tpu.dot_dimension_numbers<[1], [0], [0], [1], [0, 0, 1, 1], [], []>} : vector<8x4xf32>, vector<4x256xf32>, vector<8x256xf32> -> vector<8x256xf32>
    %73 = arith.addf %65, %72 : vector<8x256xf32>
    %c240_i32 = arith.constant 240 : i32
    %74 = tpu.dynamic_rotate %20 by %c240_i32 dim 1 : vector<4x256xf32>, i32 -> vector<4x256xf32>
    %75 = vector.extract_strided_slice %0 {offsets = [7, 0], sizes = [1, 256], strides = [1, 1]} : vector<9x256xf32> to vector<1x256xf32>
    %76 = vector.broadcast %75 : vector<1x256xf32> to vector<4x256xf32>
    %77 = arith.mulf %74, %76 : vector<4x256xf32>
    %c7 = arith.constant 7 : index
    %c0_40 = arith.constant 0 : index
    %c0_41 = arith.constant 0 : index
    %78 = vector.load %arg7[%c7, %c0_40, %c0_41] : memref<9x8x4xf32, #tpu.memory_space<vmem>>, vector<1x8x4xf32>
    %79 = vector.shape_cast %78 : vector<1x8x4xf32> to vector<8x4xf32>
    %cst_42 = arith.constant dense<0.000000e+00> : vector<8x256xf32>
    %80 = tpu.matmul %79, %77, %cst_42 {dimension_numbers = #tpu.dot_dimension_numbers<[1], [0], [0], [1], [0, 0, 1, 1], [], []>} : vector<8x4xf32>, vector<4x256xf32>, vector<8x256xf32> -> vector<8x256xf32>
    %81 = arith.addf %73, %80 : vector<8x256xf32>
    %c239_i32 = arith.constant 239 : i32
    %82 = tpu.dynamic_rotate %20 by %c239_i32 dim 1 : vector<4x256xf32>, i32 -> vector<4x256xf32>
    %83 = vector.extract_strided_slice %0 {offsets = [8, 0], sizes = [1, 256], strides = [1, 1]} : vector<9x256xf32> to vector<1x256xf32>
    %84 = vector.broadcast %83 : vector<1x256xf32> to vector<4x256xf32>
    %85 = arith.mulf %82, %84 : vector<4x256xf32>
    %c8 = arith.constant 8 : index
    %c0_43 = arith.constant 0 : index
    %c0_44 = arith.constant 0 : index
    %86 = vector.load %arg7[%c8, %c0_43, %c0_44] : memref<9x8x4xf32, #tpu.memory_space<vmem>>, vector<1x8x4xf32>
    %87 = vector.shape_cast %86 : vector<1x8x4xf32> to vector<8x4xf32>
    %cst_45 = arith.constant dense<0.000000e+00> : vector<8x256xf32>
    %88 = tpu.matmul %87, %85, %cst_45 {dimension_numbers = #tpu.dot_dimension_numbers<[1], [0], [0], [1], [0, 0, 1, 1], [], []>} : vector<8x4xf32>, vector<4x256xf32>, vector<8x256xf32> -> vector<8x256xf32>
    %89 = arith.addf %81, %88 : vector<8x256xf32>
    %cst_46 = arith.constant dense<0.000000e+00> : vector<8xf32>
    %90 = vector.multi_reduction <add>, %89, %cst_46 [1] : vector<8x256xf32> to vector<8xf32>
    %91 = vector.shape_cast %90 : vector<8xf32> to vector<8x1xf32>
    %92 = arith.mulf %89, %89 : vector<8x256xf32>
    %cst_47 = arith.constant dense<0.000000e+00> : vector<8xf32>
    %93 = vector.multi_reduction <add>, %92, %cst_47 [1] : vector<8x256xf32> to vector<8xf32>
    %94 = vector.shape_cast %93 : vector<8xf32> to vector<8x1xf32>
    %cst_48 = arith.constant 3.906250e-03 : f32
    %95 = vector.broadcast %cst_48 : f32 to vector<8x1xf32>
    %96 = arith.mulf %91, %95 : vector<8x1xf32>
    %97 = arith.mulf %91, %96 : vector<8x1xf32>
    %98 = arith.subf %94, %97 : vector<8x1xf32>
    %cst_49 = arith.constant 2.550000e+02 : f32
    %99 = vector.broadcast %cst_49 : f32 to vector<8x1xf32>
    %100 = arith.divf %98, %99 : vector<8x1xf32>
    %cst_50 = arith.constant 9.99999974E-6 : f32
    %101 = vector.broadcast %cst_50 : f32 to vector<8x1xf32>
    %102 = arith.addf %100, %101 : vector<8x1xf32>
    %103 = math.rsqrt %102 : vector<8x1xf32>
    %104 = vector.broadcast %103 : vector<8x1xf32> to vector<8x256xf32>
    %105 = arith.mulf %89, %104 : vector<8x256xf32>
    %c0_51 = arith.constant 0 : index
    %c0_52 = arith.constant 0 : index
    %106 = vector.load %arg8[%c0_51, %c0_52] : memref<8x1xf32, #tpu.memory_space<vmem>>, vector<8x1xf32>
    %107 = arith.mulf %96, %103 : vector<8x1xf32>
    %108 = arith.subf %106, %107 : vector<8x1xf32>
    %109 = vector.broadcast %108 : vector<8x1xf32> to vector<8x256xf32>
    %110 = arith.addf %105, %109 : vector<8x256xf32>
    %c0_53 = arith.constant 0 : index
    %c0_54 = arith.constant 0 : index
    %c0_55 = arith.constant 0 : index
    %111 = vector.load %arg10[%c0_53, %c0_54, %c0_55] : memref<2x8x256xf32, #tpu.memory_space<vmem>>, vector<1x8x256xf32>
    %112 = vector.shape_cast %111 : vector<1x8x256xf32> to vector<8x256xf32>
    %113 = vector.shape_cast %110 : vector<8x256xf32> to vector<1x8x256xf32>
    tpu.vector_store %arg10[%c0_53, %c0_54, %c0_55], %113 {strides = array<i32>} : memref<2x8x256xf32, #tpu.memory_space<vmem>>, vector<1x8x256xf32>,
    %c1_56 = arith.constant 1 : index
    %c0_57 = arith.constant 0 : index
    %c0_58 = arith.constant 0 : index
    %114 = vector.load %arg1[%c1_56, %c0_57, %c0_58] : memref<2x4x256xf32, #tpu.memory_space<vmem>>, vector<1x4x256xf32>
    %115 = vector.shape_cast %114 : vector<1x4x256xf32> to vector<4x256xf32>
    %c1_59 = arith.constant 1 : index
    %c0_60 = arith.constant 0 : index
    %c0_61 = arith.constant 0 : index
    %116 = vector.load %arg2[%c1_59, %c0_60, %c0_61] : memref<2x4x256xf32, #tpu.memory_space<vmem>>, vector<1x4x256xf32>
    %117 = vector.shape_cast %116 : vector<1x4x256xf32> to vector<4x256xf32>
    %c0_62 = arith.constant 0 : index
    %c0_63 = arith.constant 0 : index
    %118 = vector.load %arg3[%c0_62, %c0_63] : memref<256x4xf32, #tpu.memory_space<vmem>>, vector<256x4xf32>
    %cst_64 = arith.constant dense<0.000000e+00> : vector<256x256xf32>
    %119 = tpu.matmul %118, %117, %cst_64 {dimension_numbers = #tpu.dot_dimension_numbers<[1], [0], [0], [1], [0, 0, 1, 1], [], []>} : vector<256x4xf32>, vector<4x256xf32>, vector<256x256xf32> -> vector<256x256xf32>
    %c0_65 = arith.constant 0 : index
    %c0_66 = arith.constant 0 : index
    %120 = vector.load %arg4[%c0_65, %c0_66] : memref<256x1xf32, #tpu.memory_space<vmem>>, vector<256x1xf32>
    %121 = vector.broadcast %120 : vector<256x1xf32> to vector<256x256xf32>
    %122 = arith.addf %119, %121 : vector<256x256xf32>
    %cst_67 = arith.constant 0.000000e+00 : f32
    %123 = vector.broadcast %cst_67 : f32 to vector<256x256xf32>
    %124 = arith.maximumf %122, %123 : vector<256x256xf32>
    %c0_68 = arith.constant 0 : index
    %c0_69 = arith.constant 0 : index
    %125 = vector.load %arg5[%c0_68, %c0_69] : memref<8x256xf32, #tpu.memory_space<vmem>>, vector<8x256xf32>
    %cst_70 = arith.constant dense<0.000000e+00> : vector<8x256xf32>
    %126 = tpu.matmul %125, %124, %cst_70 {dimension_numbers = #tpu.dot_dimension_numbers<[1], [0], [0], [1], [0, 0, 1, 1], [], []>} : vector<8x256xf32>, vector<256x256xf32>, vector<8x256xf32> -> vector<8x256xf32>
    %c0_71 = arith.constant 0 : index
    %c0_72 = arith.constant 0 : index
    %127 = vector.load %arg6[%c0_71, %c0_72] : memref<8x1xf32, #tpu.memory_space<vmem>>, vector<8x1xf32>
    %128 = vector.broadcast %127 : vector<8x1xf32> to vector<8x256xf32>
    %129 = arith.addf %126, %128 : vector<8x256xf32>
    %130 = vector.extract_strided_slice %129 {offsets = [0, 0], sizes = [4, 256], strides = [1, 1]} : vector<8x256xf32> to vector<4x256xf32>
    %131 = arith.mulf %130, %115 : vector<4x256xf32>
    %132 = vector.extract_strided_slice %129 {offsets = [4, 0], sizes = [4, 256], strides = [1, 1]} : vector<8x256xf32> to vector<4x256xf32>
    %133 = arith.addf %131, %132 : vector<4x256xf32>
    %cst_73 = arith.constant 0.000000e+00 : f32
    %134 = vector.broadcast %cst_73 : f32 to vector<8x256xf32>
    %c17_i32_74 = arith.constant 17 : i32
    %135 = tpu.dynamic_rotate %133 by %c17_i32_74 dim 1 : vector<4x256xf32>, i32 -> vector<4x256xf32>
    %136 = vector.extract_strided_slice %0 {offsets = [0, 0], sizes = [1, 256], strides = [1, 1]} : vector<9x256xf32> to vector<1x256xf32>
    %137 = vector.broadcast %136 : vector<1x256xf32> to vector<4x256xf32>
    %138 = arith.mulf %135, %137 : vector<4x256xf32>
    %c0_75 = arith.constant 0 : index
    %c0_76 = arith.constant 0 : index
    %c0_77 = arith.constant 0 : index
    %139 = vector.load %arg7[%c0_75, %c0_76, %c0_77] : memref<9x8x4xf32, #tpu.memory_space<vmem>>, vector<1x8x4xf32>
    %140 = vector.shape_cast %139 : vector<1x8x4xf32> to vector<8x4xf32>
    %cst_78 = arith.constant dense<0.000000e+00> : vector<8x256xf32>
    %141 = tpu.matmul %140, %138, %cst_78 {dimension_numbers = #tpu.dot_dimension_numbers<[1], [0], [0], [1], [0, 0, 1, 1], [], []>} : vector<8x4xf32>, vector<4x256xf32>, vector<8x256xf32> -> vector<8x256xf32>
    %142 = arith.addf %134, %141 : vector<8x256xf32>
    %c16_i32_79 = arith.constant 16 : i32
    %143 = tpu.dynamic_rotate %133 by %c16_i32_79 dim 1 : vector<4x256xf32>, i32 -> vector<4x256xf32>
    %144 = vector.extract_strided_slice %0 {offsets = [1, 0], sizes = [1, 256], strides = [1, 1]} : vector<9x256xf32> to vector<1x256xf32>
    %145 = vector.broadcast %144 : vector<1x256xf32> to vector<4x256xf32>
    %146 = arith.mulf %143, %145 : vector<4x256xf32>
    %c1_80 = arith.constant 1 : index
    %c0_81 = arith.constant 0 : index
    %c0_82 = arith.constant 0 : index
    %147 = vector.load %arg7[%c1_80, %c0_81, %c0_82] : memref<9x8x4xf32, #tpu.memory_space<vmem>>, vector<1x8x4xf32>
    %148 = vector.shape_cast %147 : vector<1x8x4xf32> to vector<8x4xf32>
    %cst_83 = arith.constant dense<0.000000e+00> : vector<8x256xf32>
    %149 = tpu.matmul %148, %146, %cst_83 {dimension_numbers = #tpu.dot_dimension_numbers<[1], [0], [0], [1], [0, 0, 1, 1], [], []>} : vector<8x4xf32>, vector<4x256xf32>, vector<8x256xf32> -> vector<8x256xf32>
    %150 = arith.addf %142, %149 : vector<8x256xf32>
    %c15_i32_84 = arith.constant 15 : i32
    %151 = tpu.dynamic_rotate %133 by %c15_i32_84 dim 1 : vector<4x256xf32>, i32 -> vector<4x256xf32>
    %152 = vector.extract_strided_slice %0 {offsets = [2, 0], sizes = [1, 256], strides = [1, 1]} : vector<9x256xf32> to vector<1x256xf32>
    %153 = vector.broadcast %152 : vector<1x256xf32> to vector<4x256xf32>
    %154 = arith.mulf %151, %153 : vector<4x256xf32>
    %c2_85 = arith.constant 2 : index
    %c0_86 = arith.constant 0 : index
    %c0_87 = arith.constant 0 : index
    %155 = vector.load %arg7[%c2_85, %c0_86, %c0_87] : memref<9x8x4xf32, #tpu.memory_space<vmem>>, vector<1x8x4xf32>
    %156 = vector.shape_cast %155 : vector<1x8x4xf32> to vector<8x4xf32>
    %cst_88 = arith.constant dense<0.000000e+00> : vector<8x256xf32>
    %157 = tpu.matmul %156, %154, %cst_88 {dimension_numbers = #tpu.dot_dimension_numbers<[1], [0], [0], [1], [0, 0, 1, 1], [], []>} : vector<8x4xf32>, vector<4x256xf32>, vector<8x256xf32> -> vector<8x256xf32>
    %158 = arith.addf %150, %157 : vector<8x256xf32>
    %c1_i32_89 = arith.constant 1 : i32
    %159 = tpu.dynamic_rotate %133 by %c1_i32_89 dim 1 : vector<4x256xf32>, i32 -> vector<4x256xf32>
    %160 = vector.extract_strided_slice %0 {offsets = [3, 0], sizes = [1, 256], strides = [1, 1]} : vector<9x256xf32> to vector<1x256xf32>
    %161 = vector.broadcast %160 : vector<1x256xf32> to vector<4x256xf32>
    %162 = arith.mulf %159, %161 : vector<4x256xf32>
    %c3_90 = arith.constant 3 : index
    %c0_91 = arith.constant 0 : index
    %c0_92 = arith.constant 0 : index
    %163 = vector.load %arg7[%c3_90, %c0_91, %c0_92] : memref<9x8x4xf32, #tpu.memory_space<vmem>>, vector<1x8x4xf32>
    %164 = vector.shape_cast %163 : vector<1x8x4xf32> to vector<8x4xf32>
    %cst_93 = arith.constant dense<0.000000e+00> : vector<8x256xf32>
    %165 = tpu.matmul %164, %162, %cst_93 {dimension_numbers = #tpu.dot_dimension_numbers<[1], [0], [0], [1], [0, 0, 1, 1], [], []>} : vector<8x4xf32>, vector<4x256xf32>, vector<8x256xf32> -> vector<8x256xf32>
    %166 = arith.addf %158, %165 : vector<8x256xf32>
    %c4_94 = arith.constant 4 : index
    %c0_95 = arith.constant 0 : index
    %c0_96 = arith.constant 0 : index
    %167 = vector.load %arg7[%c4_94, %c0_95, %c0_96] : memref<9x8x4xf32, #tpu.memory_space<vmem>>, vector<1x8x4xf32>
    %168 = vector.shape_cast %167 : vector<1x8x4xf32> to vector<8x4xf32>
    %cst_97 = arith.constant dense<0.000000e+00> : vector<8x256xf32>
    %169 = tpu.matmul %168, %133, %cst_97 {dimension_numbers = #tpu.dot_dimension_numbers<[1], [0], [0], [1], [0, 0, 1, 1], [], []>} : vector<8x4xf32>, vector<4x256xf32>, vector<8x256xf32> -> vector<8x256xf32>
    %170 = arith.addf %166, %169 : vector<8x256xf32>
    %c255_i32_98 = arith.constant 255 : i32
    %171 = tpu.dynamic_rotate %133 by %c255_i32_98 dim 1 : vector<4x256xf32>, i32 -> vector<4x256xf32>
    %172 = vector.extract_strided_slice %0 {offsets = [5, 0], sizes = [1, 256], strides = [1, 1]} : vector<9x256xf32> to vector<1x256xf32>
    %173 = vector.broadcast %172 : vector<1x256xf32> to vector<4x256xf32>
    %174 = arith.mulf %171, %173 : vector<4x256xf32>
    %c5_99 = arith.constant 5 : index
    %c0_100 = arith.constant 0 : index
    %c0_101 = arith.constant 0 : index
    %175 = vector.load %arg7[%c5_99, %c0_100, %c0_101] : memref<9x8x4xf32, #tpu.memory_space<vmem>>, vector<1x8x4xf32>
    %176 = vector.shape_cast %175 : vector<1x8x4xf32> to vector<8x4xf32>
    %cst_102 = arith.constant dense<0.000000e+00> : vector<8x256xf32>
    %177 = tpu.matmul %176, %174, %cst_102 {dimension_numbers = #tpu.dot_dimension_numbers<[1], [0], [0], [1], [0, 0, 1, 1], [], []>} : vector<8x4xf32>, vector<4x256xf32>, vector<8x256xf32> -> vector<8x256xf32>
    %178 = arith.addf %170, %177 : vector<8x256xf32>
    %c241_i32_103 = arith.constant 241 : i32
    %179 = tpu.dynamic_rotate %133 by %c241_i32_103 dim 1 : vector<4x256xf32>, i32 -> vector<4x256xf32>
    %180 = vector.extract_strided_slice %0 {offsets = [6, 0], sizes = [1, 256], strides = [1, 1]} : vector<9x256xf32> to vector<1x256xf32>
    %181 = vector.broadcast %180 : vector<1x256xf32> to vector<4x256xf32>
    %182 = arith.mulf %179, %181 : vector<4x256xf32>
    %c6_104 = arith.constant 6 : index
    %c0_105 = arith.constant 0 : index
    %c0_106 = arith.constant 0 : index
    %183 = vector.load %arg7[%c6_104, %c0_105, %c0_106] : memref<9x8x4xf32, #tpu.memory_space<vmem>>, vector<1x8x4xf32>
    %184 = vector.shape_cast %183 : vector<1x8x4xf32> to vector<8x4xf32>
    %cst_107 = arith.constant dense<0.000000e+00> : vector<8x256xf32>
    %185 = tpu.matmul %184, %182, %cst_107 {dimension_numbers = #tpu.dot_dimension_numbers<[1], [0], [0], [1], [0, 0, 1, 1], [], []>} : vector<8x4xf32>, vector<4x256xf32>, vector<8x256xf32> -> vector<8x256xf32>
    %186 = arith.addf %178, %185 : vector<8x256xf32>
    %c240_i32_108 = arith.constant 240 : i32
    %187 = tpu.dynamic_rotate %133 by %c240_i32_108 dim 1 : vector<4x256xf32>, i32 -> vector<4x256xf32>
    %188 = vector.extract_strided_slice %0 {offsets = [7, 0], sizes = [1, 256], strides = [1, 1]} : vector<9x256xf32> to vector<1x256xf32>
    %189 = vector.broadcast %188 : vector<1x256xf32> to vector<4x256xf32>
    %190 = arith.mulf %187, %189 : vector<4x256xf32>
    %c7_109 = arith.constant 7 : index
    %c0_110 = arith.constant 0 : index
    %c0_111 = arith.constant 0 : index
    %191 = vector.load %arg7[%c7_109, %c0_110, %c0_111] : memref<9x8x4xf32, #tpu.memory_space<vmem>>, vector<1x8x4xf32>
    %192 = vector.shape_cast %191 : vector<1x8x4xf32> to vector<8x4xf32>
    %cst_112 = arith.constant dense<0.000000e+00> : vector<8x256xf32>
    %193 = tpu.matmul %192, %190, %cst_112 {dimension_numbers = #tpu.dot_dimension_numbers<[1], [0], [0], [1], [0, 0, 1, 1], [], []>} : vector<8x4xf32>, vector<4x256xf32>, vector<8x256xf32> -> vector<8x256xf32>
    %194 = arith.addf %186, %193 : vector<8x256xf32>
    %c239_i32_113 = arith.constant 239 : i32
    %195 = tpu.dynamic_rotate %133 by %c239_i32_113 dim 1 : vector<4x256xf32>, i32 -> vector<4x256xf32>
    %196 = vector.extract_strided_slice %0 {offsets = [8, 0], sizes = [1, 256], strides = [1, 1]} : vector<9x256xf32> to vector<1x256xf32>
    %197 = vector.broadcast %196 : vector<1x256xf32> to vector<4x256xf32>
    %198 = arith.mulf %195, %197 : vector<4x256xf32>
    %c8_114 = arith.constant 8 : index
    %c0_115 = arith.constant 0 : index
    %c0_116 = arith.constant 0 : index
    %199 = vector.load %arg7[%c8_114, %c0_115, %c0_116] : memref<9x8x4xf32, #tpu.memory_space<vmem>>, vector<1x8x4xf32>
    %200 = vector.shape_cast %199 : vector<1x8x4xf32> to vector<8x4xf32>
    %cst_117 = arith.constant dense<0.000000e+00> : vector<8x256xf32>
    %201 = tpu.matmul %200, %198, %cst_117 {dimension_numbers = #tpu.dot_dimension_numbers<[1], [0], [0], [1], [0, 0, 1, 1], [], []>} : vector<8x4xf32>, vector<4x256xf32>, vector<8x256xf32> -> vector<8x256xf32>
    %202 = arith.addf %194, %201 : vector<8x256xf32>
    %cst_118 = arith.constant dense<0.000000e+00> : vector<8xf32>
    %203 = vector.multi_reduction <add>, %202, %cst_118 [1] : vector<8x256xf32> to vector<8xf32>
    %204 = vector.shape_cast %203 : vector<8xf32> to vector<8x1xf32>
    %205 = arith.mulf %202, %202 : vector<8x256xf32>
    %cst_119 = arith.constant dense<0.000000e+00> : vector<8xf32>
    %206 = vector.multi_reduction <add>, %205, %cst_119 [1] : vector<8x256xf32> to vector<8xf32>
    %207 = vector.shape_cast %206 : vector<8xf32> to vector<8x1xf32>
    %cst_120 = arith.constant 3.906250e-03 : f32
    %208 = vector.broadcast %cst_120 : f32 to vector<8x1xf32>
    %209 = arith.mulf %204, %208 : vector<8x1xf32>
    %210 = arith.mulf %204, %209 : vector<8x1xf32>
    %211 = arith.subf %207, %210 : vector<8x1xf32>
    %cst_121 = arith.constant 2.550000e+02 : f32
    %212 = vector.broadcast %cst_121 : f32 to vector<8x1xf32>
    %213 = arith.divf %211, %212 : vector<8x1xf32>
    %cst_122 = arith.constant 9.99999974E-6 : f32
    %214 = vector.broadcast %cst_122 : f32 to vector<8x1xf32>
    %215 = arith.addf %213, %214 : vector<8x1xf32>
    %216 = math.rsqrt %215 : vector<8x1xf32>
    %217 = vector.broadcast %216 : vector<8x1xf32> to vector<8x256xf32>
    %218 = arith.mulf %202, %217 : vector<8x256xf32>
    %c0_123 = arith.constant 0 : index
    %c0_124 = arith.constant 0 : index
    %219 = vector.load %arg8[%c0_123, %c0_124] : memref<8x1xf32, #tpu.memory_space<vmem>>, vector<8x1xf32>
    %220 = arith.mulf %209, %216 : vector<8x1xf32>
    %221 = arith.subf %219, %220 : vector<8x1xf32>
    %222 = vector.broadcast %221 : vector<8x1xf32> to vector<8x256xf32>
    %223 = arith.addf %218, %222 : vector<8x256xf32>
    %c1_125 = arith.constant 1 : index
    %c0_126 = arith.constant 0 : index
    %c0_127 = arith.constant 0 : index
    %224 = vector.load %arg10[%c1_125, %c0_126, %c0_127] : memref<2x8x256xf32, #tpu.memory_space<vmem>>, vector<1x8x256xf32>
    %225 = vector.shape_cast %224 : vector<1x8x256xf32> to vector<8x256xf32>
    %226 = vector.shape_cast %223 : vector<8x256xf32> to vector<1x8x256xf32>
    tpu.vector_store %arg10[%c1_125, %c0_126, %c0_127], %226 {strides = array<i32>} : memref<2x8x256xf32, #tpu.memory_space<vmem>>, vector<1x8x256xf32>,
    return
  }
  func.func @transform_0(%arg0: i32) -> (i32, i32, i32) {
    %c0_i32 = arith.constant 0 : i32
    %c0_i32_0 = arith.constant 0 : i32
    %c0_i32_1 = arith.constant 0 : i32
    return %arg0, %c0_i32, %c0_i32_0 : i32, i32, i32
  }
  func.func @transform_1(%arg0: i32) -> (i32, i32, i32) {
    %c0_i32 = arith.constant 0 : i32
    %c0_i32_0 = arith.constant 0 : i32
    %c0_i32_1 = arith.constant 0 : i32
    return %arg0, %c0_i32, %c0_i32_0 : i32, i32, i32
  }
  func.func @transform_2(%arg0: i32) -> (i32, i32) {
    %c0_i32 = arith.constant 0 : i32
    %c0_i32_0 = arith.constant 0 : i32
    %c0_i32_1 = arith.constant 0 : i32
    return %c0_i32, %c0_i32_0 : i32, i32
  }
  func.func @transform_3(%arg0: i32) -> (i32, i32) {
    %c0_i32 = arith.constant 0 : i32
    %c0_i32_0 = arith.constant 0 : i32
    %c0_i32_1 = arith.constant 0 : i32
    return %c0_i32, %c0_i32_0 : i32, i32
  }
  func.func @transform_4(%arg0: i32) -> (i32, i32) {
    %c0_i32 = arith.constant 0 : i32
    %c0_i32_0 = arith.constant 0 : i32
    %c0_i32_1 = arith.constant 0 : i32
    return %c0_i32, %c0_i32_0 : i32, i32
  }
  func.func @transform_5(%arg0: i32) -> (i32, i32) {
    %c0_i32 = arith.constant 0 : i32
    %c0_i32_0 = arith.constant 0 : i32
    %c0_i32_1 = arith.constant 0 : i32
    return %c0_i32, %c0_i32_0 : i32, i32
  }
  func.func @transform_6(%arg0: i32) -> (i32, i32, i32) {
    %c0_i32 = arith.constant 0 : i32
    %c0_i32_0 = arith.constant 0 : i32
    %c0_i32_1 = arith.constant 0 : i32
    %c0_i32_2 = arith.constant 0 : i32
    return %c0_i32, %c0_i32_0, %c0_i32_1 : i32, i32, i32
  }
  func.func @transform_7(%arg0: i32) -> (i32, i32) {
    %c0_i32 = arith.constant 0 : i32
    %c0_i32_0 = arith.constant 0 : i32
    %c0_i32_1 = arith.constant 0 : i32
    return %c0_i32, %c0_i32_0 : i32, i32
  }
  func.func @transform_8(%arg0: i32) -> (i32, i32) {
    %c0_i32 = arith.constant 0 : i32
    %c0_i32_0 = arith.constant 0 : i32
    %c0_i32_1 = arith.constant 0 : i32
    return %c0_i32, %c0_i32_0 : i32, i32
  }
  func.func @transform_9(%arg0: i32) -> (i32, i32, i32) {
    %c0_i32 = arith.constant 0 : i32
    %c0_i32_0 = arith.constant 0 : i32
    %c0_i32_1 = arith.constant 0 : i32
    return %arg0, %c0_i32, %c0_i32_0 : i32, i32, i32
  }
}

</mosaic_0001>

<bundles_post_ra>
// kernel: tpu_custom_call.1
= control target key start
LH: loop header
LB: loop body
LE: loop exit
PB: predicated region body
PF: predicated region fallthrough
CT: control target
= control target key end

     0   :  { %vm362_vm0 = vcmask 1043456   ;;  %v4738_v2 = vmov 0.0   ;;  %vm265_vm1 = vcmask 31744   ;;  %v3482_v4 = vmov 0   ;;  %s4728_s0 = inlined_call_operand.vmem [shape: f32[2,4,256], index: 0, kind: input, shape index: {}]   ;;  %s4729_s1 = inlined_call_operand.vmem [shape: f32[2,4,256], index: 1, kind: input, shape index: {}]   ;;  %s4730_s2 = inlined_call_operand.vmem [shape: f32[256,4], index: 2, kind: input, shape index: {}]   ;;  %s4731_s3 = inlined_call_operand.vmem [shape: f32[256,1], index: 3, kind: input, shape index: {}]   ;;  %s4732_s4 = inlined_call_operand.vmem [shape: f32[8,256], index: 4, kind: input, shape index: {}]   ;;  %s4733_s5 = inlined_call_operand.vmem [shape: f32[8,1], index: 5, kind: input, shape index: {}]   ;;  %s4734_s6 = inlined_call_operand.vmem [shape: f32[9,8,4], index: 6, kind: input, shape index: {}]   ;;  %s4735_s7 = inlined_call_operand.vmem [shape: f32[8,1], index: 7, kind: input, shape index: {}]   ;;  %s4736_s8 = inlined_call_operand.vmem [shape: f32[9,256], index: 8, kind: input, shape index: {}]   ;;  %s4737_s9 = inlined_call_operand.hbm [shape: f32[2,8,256], index: 9, kind: output, shape index: {}]  }
   0x1   :  { %v38_v0 = vld [vmem:[%s4729_s1] sm:$0xff]  ;;  %431 = vmatprep.mubr.f32.mxu0 %v4738_v2  ;;  %3448 = vset.pattern.permute.xlu1 %v3482_v4  ;;  %v3555_v5 = vld [vmem:[%s4731_s3 + $0x68] sm:$0xff]  ;;  %v3560_v6 = vld [vmem:[%s4731_s3 + $0x78] sm:$0xff] }
   0x2   :  { %v264_v1 = vcombine.high %v38_v0, %v38_v0  ;;  %v39_v3 = vld [vmem:[%s4730_s2] sm:$0xff]  ;;  %3447 = vset.pattern.permute.xlu0 %v3482_v4  ;;  %170 = vperm.xlu1 %3448, %v3555_v5   ;;  %v40_v7 = vld [vmem:[%s4730_s2 + $0x8] sm:$0xff]  ;;  %v3577_v9 = vld [vmem:[%s4731_s3 + $0x70] sm:$0xff] }
   0x3   :  { %180 = vperm.xlu0 %3447, %v3560_v6   ;;  %v3572_v8 = vld [vmem:[%s4731_s3 + $0x60] sm:$0xff]  ;;  %v41_v10 = vld [vmem:[%s4730_s2 + $0x10] sm:$0xff]  ;;  %v3594_v12 = vld [vmem:[%s4731_s3 + $0x58] sm:$0xff] }
   0x4   :  { %3293 = vmatprep.subr.msk.mxu0 %vm362_vm0, %v264_v1  ;;  %v3589_v11 = vld [vmem:[%s4731_s3 + $0x50] sm:$0xff]  ;;  %v42_v13 = vld [vmem:[%s4730_s2 + $0x18] sm:$0xff]  ;;  %v3606_v14 = vld [vmem:[%s4731_s3 + $0x40] sm:$0xff] }
   0x5   :  { %3294 = vmatpush1.msk.msra.mxu0 %vm362_vm0, %v38_v0  ;;  %v3611_v15 = vld [vmem:[%s4731_s3 + $0x48] sm:$0xff]  ;;  %v43_v16 = vld [vmem:[%s4730_s2 + $0x20] sm:$0xff]  ;;  %v3623_v17 = vld [vmem:[%s4731_s3 + $0x30] sm:$0xff] }
   0x6   :  { %3295 = vmatmul.mubr.msk.f32.vlgmr.msra.gmra.mxu0 %vm265_vm1, %v39_v3  ;;  %165 = vperm.xlu1 %3448, %v3572_v8   ;;  %4774 = vst [vmem:[#allocation5_spill] sm:$0xff] %v3623_v17  ;;  %v3628_v18 = vld [vmem:[%s4731_s3 + $0x38] sm:$0xff]  ;;  %v44_v19 = vld [vmem:[%s4730_s2 + $0x28] sm:$0xff]  ;;  %v3640_v20 = vld [vmem:[%s4731_s3 + $0x20] sm:$0xff] }
   0x7   :  { %437 = vmatprep.mubr.f32.mxu0 %v4738_v2  ;;  %175 = vperm.xlu0 %3447, %v3577_v9   ;;  %4775 = vst [vmem:[#allocation6_spill] sm:$0xff] %v3628_v18  ;;  %4776 = vst [vmem:[#allocation7_spill] sm:$0xff] %v3640_v20 }
   0xa   :  { %3296 = vmatmul.mubr.msk.f32.gmra.mxu0 %vm265_vm1, %v40_v7  ;;  %155 = vperm.xlu1 %3448, %v3589_v11  }
   0xb   :  { %443 = vmatprep.mubr.f32.mxu0 %v4738_v2  ;;  %160 = vperm.xlu0 %3447, %v3594_v12  }
   0xe   :  { %3297 = vmatmul.mubr.msk.f32.gmra.mxu0 %vm265_vm1, %v41_v10  ;;  %145 = vperm.xlu1 %3448, %v3606_v14  }
   0xf   :  { %449 = vmatprep.mubr.f32.mxu0 %v4738_v2  ;;  %150 = vperm.xlu0 %3447, %v3611_v15  }
  0x12   :  { %3298 = vmatmul.mubr.msk.f32.gmra.mxu0 %vm265_vm1, %v42_v13  ;;  %135 = vperm.xlu1 %3448, %v3623_v17  }
  0x13   :  { %455 = vmatprep.mubr.f32.mxu0 %v4738_v2  ;;  %140 = vperm.xlu0 %3447, %v3628_v18  }
  0x16   :  { %3299 = vmatmul.mubr.msk.f32.gmra.mxu0 %vm265_vm1, %v43_v16 }
  0x17   :  { %461 = vmatprep.mubr.f32.mxu0 %v4738_v2 }
  0x18   :  { %14 = vsyncpa [#allocation3], 0  ;;  %v3645_v21 = vld [vmem:[%s4731_s3 + $0x28] sm:$0xff]  ;;  %125 = vperm.xlu1 %3448, %v3640_v20   ;;  %v45_v22 = vld [vmem:[%s4730_s2 + $0x30] sm:$0xff]  ;;  %s3483_s17 = smov 16   ;;  %s3484_s18 = smov 17  }
  0x19   :  { %4777 = vst [vmem:[#allocation8_spill] sm:$0xff] %v3645_v21  ;;  %130 = vperm.xlu0 %3447, %v3645_v21   ;;  %v3657_v23 = vld [vmem:[%s4731_s3 + $0x10] sm:$0xff]  ;;  %v3662_v24 = vld [vmem:[%s4731_s3 + $0x18] sm:$0xff]  ;;  %v3674_v26 = vld [vmem:[%s4731_s3] sm:$0xff]  ;;  %s3485_s19 = smov 15   ;;  %s3486_s20 = smov 1  }
  0x1a   :  { %3300 = vmatmul.mubr.msk.f32.gmra.mxu0 %vm265_vm1, %v44_v19  ;;  %4778 = vst [vmem:[#allocation9_spill] sm:$0xff] %v3657_v23  ;;  %4779 = vst [vmem:[#allocation10_spill] sm:$0xff] %v3662_v24  ;;  %v46_v25 = vld [vmem:[%s4730_s2 + $0x38] sm:$0xff]  ;;  %v3679_v27 = vld [vmem:[%s4731_s3 + $0x8] sm:$0xff]  ;;  %s3487_s21 = smov 127   ;;  %s3488_s22 = smov 113  }
  0x1b   :  { %467 = vmatprep.mubr.f32.mxu0 %v4738_v2  ;;  %4780 = vst [vmem:[#allocation11_spill] sm:$0xff] %v3674_v26  ;;  %4781 = vst [vmem:[#allocation12_spill] sm:$0xff] %v3679_v27  ;;  %v47_v28 = vld [vmem:[%s4730_s2 + $0x40] sm:$0xff]  ;;  %v3691_v29 = vld [vmem:[%s4731_s3 + $0xf0] sm:$0xff]  ;;  %s3489_s23 = smov 112   ;;  %s3490_s24 = smov 111  }
  0x1c   :  { %115 = vperm.xlu1 %3448, %v3657_v23   ;;  %4782 = vst [vmem:[#allocation13_spill] sm:$0xff] %v3691_v29  ;;  %v3696_v30 = vld [vmem:[%s4731_s3 + $0xf8] sm:$0xff]  ;;  %v48_v31 = vld [vmem:[%s4730_s2 + $0x48] sm:$0xff]  ;;  %v3708_v32 = vld [vmem:[%s4731_s3 + $0xe0] sm:$0xff] }
  0x1d   :  { %120 = vperm.xlu0 %3447, %v3662_v24   ;;  %4783 = vst [vmem:[#allocation14_spill] sm:$0xff] %v3696_v30  ;;  %4784 = vst [vmem:[#allocation15_spill] sm:$0xff] %v3708_v32  ;;  %v3713_v33 = vld [vmem:[%s4731_s3 + $0xe8] sm:$0xff]  ;;  %v49_v34 = vld [vmem:[%s4730_s2 + $0x50] sm:$0xff] }
  0x1e   :  { %3301 = vmatmul.mubr.msk.f32.gmra.mxu0 %vm265_vm1, %v45_v22  ;;  %4785 = vst [vmem:[#allocation16_spill] sm:$0xff] %v3713_v33  ;;  %v3725_v35 = vld [vmem:[%s4731_s3 + $0xd0] sm:$0xff]  ;;  %v3730_v36 = vld [vmem:[%s4731_s3 + $0xd8] sm:$0xff]  ;;  %v3742_v38 = vld [vmem:[%s4731_s3 + $0xc0] sm:$0xff] }
  0x1f   :  { %473 = vmatprep.mubr.f32.mxu0 %v4738_v2  ;;  %4786 = vst [vmem:[#allocation17_spill] sm:$0xff] %v3725_v35  ;;  %4787 = vst [vmem:[#allocation18_spill] sm:$0xff] %v3730_v36  ;;  %v50_v37 = vld [vmem:[%s4730_s2 + $0x58] sm:$0xff]  ;;  %v3747_v39 = vld [vmem:[%s4731_s3 + $0xc8] sm:$0xff] }
  0x20   :  { %105 = vperm.xlu1 %3448, %v3674_v26   ;;  %4788 = vst [vmem:[#allocation19_spill] sm:$0xff] %v3742_v38  ;;  %4789 = vst [vmem:[#allocation20_spill] sm:$0xff] %v3747_v39  ;;  %v51_v40 = vld [vmem:[%s4730_s2 + $0x60] sm:$0xff]  ;;  %v3759_v41 = vld [vmem:[%s4731_s3 + $0xb0] sm:$0xff] }
  0x21   :  { %110 = vperm.xlu0 %3447, %v3679_v27   ;;  %4790 = vst [vmem:[#allocation21_spill] sm:$0xff] %v3759_v41  ;;  %v3764_v42 = vld [vmem:[%s4731_s3 + $0xb8] sm:$0xff]  ;;  %v52_v43 = vld [vmem:[%s4730_s2 + $0x68] sm:$0xff]  ;;  %v3776_v44 = vld [vmem:[%s4731_s3 + $0xa0] sm:$0xff] }
  0x22   :  { %3302 = vmatmul.mubr.msk.f32.gmra.mxu0 %vm265_vm1, %v46_v25  ;;  %4791 = vst [vmem:[#allocation22_spill] sm:$0xff] %v3764_v42  ;;  %4792 = vst [vmem:[#allocation23_spill] sm:$0xff] %v3776_v44  ;;  %v3781_v45 = vld [vmem:[%s4731_s3 + $0xa8] sm:$0xff]  ;;  %v53_v46 = vld [vmem:[%s4730_s2 + $0x70] sm:$0xff] }
  0x23   :  { %479 = vmatprep.mubr.f32.mxu0 %v4738_v2  ;;  %4793 = vst [vmem:[#allocation24_spill] sm:$0xff] %v3781_v45  ;;  %v3793_v47 = vld [vmem:[%s4731_s3 + $0x90] sm:$0xff]  ;;  %v3798_v48 = vld [vmem:[%s4731_s3 + $0x98] sm:$0xff]  ;;  %v3810_v50 = vld [vmem:[%s4731_s3 + $0x80] sm:$0xff] }
  0x24   :  { %255 = vperm.xlu1 %3448, %v3691_v29   ;;  %4794 = vst [vmem:[#allocation25_spill] sm:$0xff] %v3793_v47  ;;  %4795 = vst [vmem:[#allocation26_spill] sm:$0xff] %v3798_v48  ;;  %v54_v49 = vld [vmem:[%s4730_s2 + $0x78] sm:$0xff]  ;;  %v3815_v51 = vld [vmem:[%s4731_s3 + $0x88] sm:$0xff] }
  0x25   :  { %260 = vperm.xlu0 %3447, %v3696_v30   ;;  %4796 = vst [vmem:[#allocation27_spill] sm:$0xff] %v3810_v50  ;;  %4797 = vst [vmem:[#allocation28_spill] sm:$0xff] %v3815_v51  ;;  %v55_v52 = vld [vmem:[%s4730_s2 + $0x80] sm:$0xff]  ;;  %v56_v54 = vld [vmem:[%s4730_s2 + $0x88] sm:$0xff] }
  0x26   :  { %3303 = vmatmul.mubr.msk.f32.gmra.mxu0 %vm265_vm1, %v47_v28  ;;  %v3827_v53 = vld [vmem:[%s4733_s5] sm:$0xff]  ;;  %v57_v55 = vld [vmem:[%s4730_s2 + $0x90] sm:$0xff]  ;;  %v58_v56 = vld [vmem:[%s4730_s2 + $0x98] sm:$0xff] }
  0x27   :  { %485 = vmatprep.mubr.f32.mxu0 %v4738_v2  ;;  %4798 = vst [vmem:[#allocation29_spill] sm:$0xff] %v3827_v53  ;;  %v59_v57 = vld [vmem:[%s4730_s2 + $0xa0] sm:$0xff]  ;;  %v60_v58 = vld [vmem:[%s4730_s2 + $0xa8] sm:$0xff]  ;;  %v61_v59 = vld [vmem:[%s4730_s2 + $0xb0] sm:$0xff] }
  0x28   :  { %245 = vperm.xlu1 %3448, %v3708_v32   ;;  %v62_v60 = vld [vmem:[%s4730_s2 + $0xb8] sm:$0xff]  ;;  %v63_v61 = vld [vmem:[%s4730_s2 + $0xc0] sm:$0xff]  ;;  %v64_v62 = vld [vmem:[%s4730_s2 + $0xc8] sm:$0xff] }
  0x29   :  { %250 = vperm.xlu0 %3447, %v3713_v33   ;;  %v65_v63 = vld [vmem:[%s4730_s2 + $0xd0] sm:$0xff]  ;;  %v66_v0 = vld [vmem:[%s4730_s2 + $0xd8] sm:$0xff]  ;;  %v67_v1 = vld [vmem:[%s4730_s2 + $0xe0] sm:$0xff] }
  0x2a   :  { %3304 = vmatmul.mubr.msk.f32.gmra.mxu0 %vm265_vm1, %v48_v31  ;;  %v68_v3 = vld [vmem:[%s4730_s2 + $0xe8] sm:$0xff]  ;;  %v69_v4 = vld [vmem:[%s4730_s2 + $0xf0] sm:$0xff]  ;;  %v70_v7 = vld [vmem:[%s4730_s2 + $0xf8] sm:$0xff] }
  0x2b   :  { %491 = vmatprep.mubr.f32.mxu0 %v4738_v2 }
  0x2c   :  { %235 = vperm.xlu1 %3448, %v3725_v35  }
  0x2d   :  { %240 = vperm.xlu0 %3447, %v3730_v36  }
  0x2e   :  { %3305 = vmatmul.mubr.msk.f32.gmra.mxu0 %vm265_vm1, %v49_v34 }
  0x2f   :  { %497 = vmatprep.mubr.f32.mxu0 %v4738_v2 }
  0x30   :  { %225 = vperm.xlu1 %3448, %v3742_v38  }
  0x31   :  { %230 = vperm.xlu0 %3447, %v3747_v39  }
  0x32   :  { %3306 = vmatmul.mubr.msk.f32.gmra.mxu0 %vm265_vm1, %v50_v37 }
  0x33   :  { %503 = vmatprep.mubr.f32.mxu0 %v4738_v2 }
  0x34   :  { %215 = vperm.xlu1 %3448, %v3759_v41  }
  0x35   :  { %220 = vperm.xlu0 %3447, %v3764_v42  }
  0x36   :  { %3307 = vmatmul.mubr.msk.f32.gmra.mxu0 %vm265_vm1, %v51_v40 }
  0x37   :  { %509 = vmatprep.mubr.f32.mxu0 %v4738_v2 }
  0x38   :  { %205 = vperm.xlu1 %3448, %v3776_v44  }
  0x39   :  { %210 = vperm.xlu0 %3447, %v3781_v45  }
  0x3a   :  { %3308 = vmatmul.mubr.msk.f32.gmra.mxu0 %vm265_vm1, %v52_v43 }
  0x3b   :  { %515 = vmatprep.mubr.f32.mxu0 %v4738_v2 }
  0x3c   :  { %195 = vperm.xlu1 %3448, %v3793_v47  }
  0x3d   :  { %200 = vperm.xlu0 %3447, %v3798_v48  }
  0x3e   :  { %3309 = vmatmul.mubr.msk.f32.gmra.mxu0 %vm265_vm1, %v53_v46 }
  0x3f   :  { %521 = vmatprep.mubr.f32.mxu0 %v4738_v2 }
  0x40   :  { %185 = vperm.xlu1 %3448, %v3810_v50  }
  0x41   :  { %190 = vperm.xlu0 %3447, %v3815_v51  }
  0x42   :  { %3310 = vmatmul.mubr.msk.f32.gmra.mxu0 %vm265_vm1, %v54_v49 }
  0x43   :  { %527 = vmatprep.mubr.f32.mxu0 %v4738_v2 }
  0x45   :  { %693 = vperm.xlu0 %3447, %v3827_v53  }
  0x46   :  { %3311 = vmatmul.mubr.msk.f32.gmra.mxu0 %vm265_vm1, %v55_v52 }
  0x47   :  { %533 = vmatprep.mubr.f32.mxu0 %v4738_v2 }
  0x4a   :  { %3312 = vmatmul.mubr.msk.f32.gmra.mxu0 %vm265_vm1, %v56_v54 }
  0x4b   :  { %539 = vmatprep.mubr.f32.mxu0 %v4738_v2 }
  0x4e   :  { %3313 = vmatmul.mubr.msk.f32.gmra.mxu0 %vm265_vm1, %v57_v55 }
  0x4f   :  { %545 = vmatprep.mubr.f32.mxu0 %v4738_v2 }
  0x52   :  { %3314 = vmatmul.mubr.msk.f32.gmra.mxu0 %vm265_vm1, %v58_v56  ;;  %v689_v56 = vld [vmem:[%s4732_s4 + $0x8] sm:$0xff] }
  0x53   :  { %551 = vmatprep.mubr.f32.mxu0 %v4738_v2  ;;  %760 = vmatprep.mubr.f32.mxu1 %v689_v56 }
  0x56   :  { %3315 = vmatmul.mubr.msk.f32.gmra.mxu0 %vm265_vm1, %v59_v57 }
  0x57   :  { %557 = vmatprep.mubr.f32.mxu0 %v4738_v2 }
  0x5a   :  { %3316 = vmatmul.mubr.msk.f32.gmra.mxu0 %vm265_vm1, %v60_v58 }
  0x5b   :  { %563 = vmatprep.mubr.f32.mxu0 %v4738_v2 }
  0x5e   :  { %3317 = vmatmul.mubr.msk.f32.gmra.mxu0 %vm265_vm1, %v61_v59 }
  0x5f   :  { %569 = vmatprep.mubr.f32.mxu0 %v4738_v2 }
  0x62   :  { %3318 = vmatmul.mubr.msk.f32.gmra.mxu0 %vm265_vm1, %v62_v60 }
  0x63   :  { %575 = vmatprep.mubr.f32.mxu0 %v4738_v2 }
  0x66   :  { %3319 = vmatmul.mubr.msk.f32.gmra.mxu0 %vm265_vm1, %v63_v61 }
  0x67   :  { %581 = vmatprep.mubr.f32.mxu0 %v4738_v2 }
  0x6a   :  { %3320 = vmatmul.mubr.msk.f32.gmra.mxu0 %vm265_vm1, %v64_v62 }
  0x6b   :  { %587 = vmatprep.mubr.f32.mxu0 %v4738_v2 }
  0x6e   :  { %3321 = vmatmul.mubr.msk.f32.gmra.mxu0 %vm265_vm1, %v65_v63 }
  0x6f   :  { %593 = vmatprep.mubr.f32.mxu0 %v4738_v2 }
  0x72   :  { %3322 = vmatmul.mubr.msk.f32.gmra.mxu0 %vm265_vm1, %v66_v0 }
  0x73   :  { %599 = vmatprep.mubr.f32.mxu0 %v4738_v2 }
  0x76   :  { %3323 = vmatmul.mubr.msk.f32.gmra.mxu0 %vm265_vm1, %v67_v1 }
  0x77   :  { %605 = vmatprep.mubr.f32.mxu0 %v4738_v2 }
  0x7a   :  { %3324 = vmatmul.mubr.msk.f32.gmra.mxu0 %vm265_vm1, %v68_v3 }
  0x7b   :  { %611 = vmatprep.mubr.f32.mxu0 %v4738_v2 }
  0x7d   :  { %v171_v1 = vpop.permute.xlu1 %170 }
  0x7e   :  { %3325 = vmatmul.mubr.msk.f32.gmra.mxu0 %vm265_vm1, %v69_v4  ;;  %v181_v63 = vpop.permute.xlu0 %180 }
  0x7f   :  { %617 = vmatprep.mubr.f32.mxu0 %v4738_v2 }
  0x81   :  { %v166_v53 = vpop.permute.xlu1 %165 }
  0x82   :  { %3326 = vmatmul.mubr.msk.f32.gmra.mxu0 %vm265_vm1, %v70_v7  ;;  %v176_v7 = vpop.permute.xlu0 %175 }
  0x85   :  { %v156_v44 = vpop.permute.xlu1 %155 }
  0x86   :  { %v161_v47 = vpop.permute.xlu0 %160 }
  0x89   :  { %v146_v32 = vpop.permute.xlu1 %145 }
  0x8a   :  { %v151_v42 = vpop.permute.xlu0 %150 }
  0xc6   :  { %v3906_v10 = vpop.f32.mrf.mxu0 }
  0xc8   :  { %v3908_v13 = vpop.f32.mrf.mxu0 }
  0xca   :  { %v3910_v16 = vpop.f32.mrf.mxu0 }
  0xcc   :  { %v3912_v19 = vpop.f32.mrf.mxu0 }
  0xce   :  { %v3914_v22 = vpop.f32.mrf.mxu0 }
  0xd0   :  { %v3916_v25 = vpop.f32.mrf.mxu0 }
  0xd2   :  { %v3918_v28 = vpop.f32.mrf.mxu0 }
  0xd4   :  { %v3920_v31 = vpop.f32.mrf.mxu0 }
  0xd6   :  { %v3922_v34 = vpop.f32.mrf.mxu0 }
  0xd8   :  { %v3924_v37 = vpop.f32.mrf.mxu0 }
  0xda   :  { %v3926_v40 = vpop.f32.mrf.mxu0 }
  0xdc   :  { %v3928_v43 = vpop.f32.mrf.mxu0 }
  0xde   :  { %v3930_v46 = vpop.f32.mrf.mxu0 }
  0xe0   :  { %v3932_v49 = vpop.f32.mrf.mxu0 }
  0xe2   :  { %v3934_v52 = vpop.f32.mrf.mxu0 }
  0xe4   :  { %v3936_v54 = vpop.f32.mrf.mxu0 }
  0xe6   :  { %v3938_v55 = vpop.f32.mrf.mxu0 }
  0xe8   :  { %v3943_v57 = vpop.f32.mrf.mxu0 }
  0xea   :  { %v487_v58 = vpop.f32.mrf.mxu0 }
  0xec   :  { %v489_v59 = vpop.f32.mrf.mxu0 }
  0xee   :  { %v493_v60 = vpop.f32.mrf.mxu0 }
  0xf0   :  { %v495_v61 = vpop.f32.mrf.mxu0 }
  0xf2   :  { %v499_v62 = vpop.f32.mrf.mxu0 }
  0xf4   :  { %v501_v0 = vpop.f32.mrf.mxu0 }
  0xf6   :  { %v505_v3 = vpop.f32.mrf.mxu0 }
  0xf7   :  { %v506_v20 = vadd.f32 %v505_v3, %v166_v53 }
  0xf8   :  { %v507_v4 = vpop.f32.mrf.mxu0 }
  0xf9   :  { %v508_v23 = vadd.f32 %v507_v4, %v166_v53 }
  0xfa   :  { %v511_v2 = vpop.f32.mrf.mxu0 }
  0xfb   :  { %v512_v30 = vadd.f32 %v511_v2, %v171_v1  ;;  %v136_v2 = vpop.permute.xlu1 %135 }
  0xfc   :  { %v513_v50 = vpop.f32.mrf.mxu0 }
  0xfd   :  { %v514_v33 = vadd.f32 %v513_v50, %v171_v1  ;;  %v649_v1 = vmax.f32 %v508_v23, 0.0  ;;  %v482_v23 = vadd.f32 %v3938_v55, %v146_v32 }
  0xfe   :  { %v517_v51 = vpop.f32.mrf.mxu0 }
  0xff   :  { %v518_v35 = vadd.f32 %v517_v51, %v176_v7  ;;  %v651_v51 = vmax.f32 %v514_v33, 0.0  ;;  %v640_v55 = vmax.f32 %v482_v23, 0.0 }
 0x100   :  { %v519_v48 = vpop.f32.mrf.mxu0 }
 0x101   :  { %v520_v38 = vadd.f32 %v519_v48, %v176_v7  ;;  %v652_v21 = vmax.f32 %v518_v35, 0.0  ;;  %v141_v48 = vpop.permute.xlu0 %140  ;;  %v650_v7 = vmax.f32 %v512_v30, 0.0  ;;  %v490_v35 = vadd.f32 %v489_v59, %v151_v42 }
 0x102   :  { %v523_v45 = vpop.f32.mrf.mxu0  ;;  %v478_v59 = vadd.f32 %v3936_v54, %v141_v48 }
 0x103   :  { %v524_v56 = vadd.f32 %v523_v45, %v181_v63  ;;  %v653_v24 = vmax.f32 %v520_v38, 0.0  ;;  %v494_v38 = vadd.f32 %v493_v60, %v156_v44  ;;  %v126_v60 = vpop.permute.xlu1 %125 }
 0x104   :  { %v525_v41 = vpop.f32.mrf.mxu0 }
 0x105   :  { %v526_v39 = vadd.f32 %v525_v41, %v181_v63  ;;  %v654_v26 = vmax.f32 %v524_v56, 0.0  ;;  %v502_v41 = vadd.f32 %v501_v0, %v161_v47  ;;  %v500_v63 = vadd.f32 %v499_v62, %v161_v47  ;;  %v131_v30 = vpop.permute.xlu0 %130 }
 0x106   :  { %v3945_v36 = vpop.f32.mrf.mxu0  ;;  %v488_v0 = vadd.f32 %v487_v58, %v151_v42  ;;  %v476_v42 = vadd.f32 %v3934_v52, %v141_v48  ;;  %v466_v54 = vadd.f32 %v3928_v43, %v131_v30  ;;  %v464_v52 = vadd.f32 %v3926_v40, %v131_v30 }
 0x107   :  { %v655_v29 = vmax.f32 %v526_v39, 0.0  ;;  %v496_v39 = vadd.f32 %v495_v61, %v156_v44  ;;  %v646_v33 = vmax.f32 %v500_v63, 0.0  ;;  %v644_v44 = vmax.f32 %v494_v38, 0.0 }
 0x108   :  { %v3947_v27 = vpop.f32.mrf.mxu0  ;;  %v643_v61 = vmax.f32 %v490_v35, 0.0  ;;  %v642_v58 = vmax.f32 %v488_v0, 0.0  ;;  %v638_v48 = vmax.f32 %v476_v42, 0.0  ;;  %v460_v63 = vadd.f32 %v3924_v37, %v126_v60 }
 0x109   :  { %696 = vmatprep.subr.mxu1 %v655_v29  ;;  %v648_v29 = vmax.f32 %v506_v20, 0.0  ;;  %v645_v47 = vmax.f32 %v496_v39, 0.0  ;;  %v121_v56 = vpop.permute.xlu0 %120  ;;  %v634_v38 = vmax.f32 %v464_v52, 0.0 }
 0x10a   :  { %v3949_v45 = vpop.f32.mrf.mxu0  ;;  %697 = vmatpush1.msra.mxu1 %v654_v26  ;;  %v647_v26 = vmax.f32 %v502_v41, 0.0  ;;  %v639_v41 = vmax.f32 %v478_v59, 0.0  ;;  %v454_v43 = vadd.f32 %v3920_v31, %v121_v56  ;;  %v452_v40 = vadd.f32 %v3918_v28, %v121_v56 }
 0x10b   :  { %698 = vmatprep.subr.mxu1 %v653_v24 }
 0x10c   :  { %v3951_v50 = vpop.f32.mrf.mxu0  ;;  %699 = vmatpush1.msra.mxu1 %v652_v21  ;;  %v484_v21 = vadd.f32 %v3943_v57, %v146_v32  ;;  %v472_v57 = vadd.f32 %v3932_v49, %v136_v2  ;;  %v470_v32 = vadd.f32 %v3930_v46, %v136_v2  ;;  %v116_v49 = vpop.permute.xlu1 %115  ;;  %v458_v46 = vadd.f32 %v3922_v34, %v126_v60 }
 0x10d   :  { %700 = vmatprep.subr.mxu1 %v651_v51  ;;  %v111_v35 = vpop.permute.xlu0 %110  ;;  %v448_v37 = vadd.f32 %v3916_v25, %v116_v49  ;;  %v446_v34 = vadd.f32 %v3914_v22, %v116_v49 }
 0x10e   :  { %v3953_v53 = vpop.f32.mrf.mxu0  ;;  %701 = vmatpush1.msra.mxu1 %v650_v7  ;;  %v641_v3 = vmax.f32 %v484_v21, 0.0  ;;  %v637_v7 = vmax.f32 %v472_v57, 0.0  ;;  %v636_v2 = vmax.f32 %v470_v32, 0.0  ;;  %v632_v0 = vmax.f32 %v458_v46, 0.0 }
 0x10f   :  { %702 = vmatprep.subr.mxu1 %v649_v1  ;;  %v635_v1 = vmax.f32 %v466_v54, 0.0  ;;  %v442_v30 = vadd.f32 %v3912_v19, %v111_v35  ;;  %v631_v21 = vmax.f32 %v454_v43, 0.0  ;;  %v440_v28 = vadd.f32 %v3910_v16, %v111_v35 }
 0x110   :  { %v3955_v24 = vpop.f32.mrf.mxu0  ;;  %703 = vmatpush1.msra.mxu1 %v648_v29  ;;  %v106_v31 = vpop.permute.xlu1 %105  ;;  %v628_v60 = vmax.f32 %v446_v34, 0.0 }
 0x111   :  { %704 = vmatprep.subr.mxu1 %v647_v26  ;;  %v633_v26 = vmax.f32 %v460_v63, 0.0  ;;  %v436_v25 = vadd.f32 %v3908_v13, %v106_v31  ;;  %v434_v22 = vadd.f32 %v3906_v10, %v106_v31  ;;  %v626_v19 = vmax.f32 %v440_v28, 0.0  ;;  %v261_v54 = vpop.permute.xlu0 %260 }
 0x112   :  { %v3959_v20 = vpop.f32.mrf.mxu0  ;;  %705 = vmatpush1.msra.mxu1 %v646_v33 }
 0x113   :  { %706 = vmatprep.subr.mxu1 %v645_v47  ;;  %v630_v47 = vmax.f32 %v452_v40, 0.0  ;;  %v625_v16 = vmax.f32 %v436_v25, 0.0 }
 0x114   :  { %v3963_v62 = vpop.f32.mrf.mxu0  ;;  %707 = vmatpush1.msra.mxu1 %v644_v44  ;;  %v629_v44 = vmax.f32 %v448_v37, 0.0  ;;  %v256_v52 = vpop.permute.xlu1 %255 }
 0x115   :  { %708 = vmatprep.subr.mxu1 %v643_v61  ;;  %v627_v61 = vmax.f32 %v442_v30, 0.0  ;;  %v251_v63 = vpop.permute.xlu0 %250 }
 0x116   :  { %v3967_v4 = vpop.f32.mrf.mxu0  ;;  %709 = vmatpush1.msra.mxu1 %v642_v58  ;;  %v624_v58 = vmax.f32 %v434_v22, 0.0 }
 0x117   :  { %710 = vmatprep.subr.mxu1 %v641_v3 }
 0x118   :  { %v3971_v51 = vpop.f32.mrf.mxu0  ;;  %711 = vmatpush1.msra.mxu1 %v640_v55  ;;  %v246_v46 = vpop.permute.xlu1 %245 }
 0x119   :  { %712 = vmatprep.subr.mxu1 %v639_v41 }
 0x11a   :  { %v3975_v39 = vpop.f32.mrf.mxu0  ;;  %713 = vmatpush1.msra.mxu1 %v638_v48 }
 0x11b   :  { %714 = vmatprep.subr.mxu1 %v637_v7 }
 0x11c   :  { %v3979_v29 = vpop.f32.mrf.mxu0  ;;  %715 = vmatpush1.msra.mxu1 %v636_v2 }
 0x11d   :  { %716 = vmatprep.subr.mxu1 %v635_v1  ;;  %v241_v1 = vpop.permute.xlu0 %240 }
 0x11e   :  { %v3983_v33 = vpop.f32.mrf.mxu0  ;;  %717 = vmatpush1.msra.mxu1 %v634_v38  ;;  %v236_v38 = vpop.permute.xlu1 %235 }
 0x11f   :  { %718 = vmatprep.subr.mxu1 %v633_v26 }
 0x120   :  { %v3987_v23 = vpop.f32.mrf.mxu0  ;;  %719 = vmatpush1.msra.mxu1 %v632_v0 }
 0x121   :  { %720 = vmatprep.subr.mxu1 %v631_v21  ;;  %v231_v34 = vpop.permute.xlu0 %230 }
 0x122   :  { %v3991_v59 = vpop.f32.mrf.mxu0  ;;  %721 = vmatpush1.msra.mxu1 %v630_v47  ;;  %v226_v21 = vpop.permute.xlu1 %225 }
 0x123   :  { %722 = vmatprep.subr.mxu1 %v629_v44 }
 0x124   :  { %v3993_v42 = vpop.f32.mrf.mxu0  ;;  %723 = vmatpush1.msra.mxu1 %v628_v60 }
 0x125   :  { %724 = vmatprep.subr.mxu1 %v627_v61 }
 0x126   :  { %v3995_v57 = vpop.f32.mrf.mxu0  ;;  %725 = vmatpush1.msra.mxu1 %v626_v19 }
 0x127   :  { %726 = vmatprep.subr.mxu1 %v625_v16  ;;  %v221_v16 = vpop.permute.xlu0 %220 }
 0x128   :  { %v579_v13 = vpop.f32.mrf.mxu0  ;;  %727 = vmatpush1.msra.mxu1 %v624_v58 }
 0x12a   :  { %v583_v10 = vpop.f32.mrf.mxu0 }
 0x12c   :  { %v585_v3 = vpop.f32.mrf.mxu0 }
 0x12e   :  { %v589_v32 = vpop.f32.mrf.mxu0 }
 0x130   :  { %v591_v55 = vpop.f32.mrf.mxu0 }
 0x132   :  { %v595_v56 = vpop.f32.mrf.mxu0 }
 0x134   :  { %v597_v41 = vpop.f32.mrf.mxu0 }
 0x135   :  { %v598_v58 = vadd.f32 %v597_v41, %v241_v1  ;;  %v580_v41 = vadd.f32 %v579_v13, %v226_v21 }
 0x136   :  { %v601_v48 = vpop.f32.mrf.mxu0 }
 0x137   :  { %v602_v61 = vadd.f32 %v601_v48, %v246_v46  ;;  %v584_v48 = vadd.f32 %v583_v10, %v231_v34 }
 0x138   :  { %v603_v49 = vpop.f32.mrf.mxu0 }
 0x139   :  { %v604_v22 = vadd.f32 %v603_v49, %v246_v46  ;;  %v586_v49 = vadd.f32 %v585_v3, %v231_v34  ;;  %v674_v3 = vmax.f32 %v584_v48, 0.0 }
 0x13a   :  { %v607_v7 = vpop.f32.mrf.mxu0 }
 0x13b   :  { %v608_v25 = vadd.f32 %v607_v7, %v251_v63  ;;  %v679_v7 = vmax.f32 %v598_v58, 0.0 }
 0x13c   :  { %v609_v2 = vpop.f32.mrf.mxu0 }
 0x13d   :  { %v610_v28 = vadd.f32 %v609_v2, %v251_v63  ;;  %v682_v18 = vmax.f32 %v608_v25, 0.0  ;;  %v590_v2 = vadd.f32 %v589_v32, %v236_v38  ;;  %v680_v63 = vmax.f32 %v602_v61, 0.0 }
 0x13e   :  { %v613_v43 = vpop.f32.mrf.mxu0  ;;  %v675_v32 = vmax.f32 %v586_v49, 0.0 }
 0x13f   :  { %v614_v30 = vadd.f32 %v613_v43, %v256_v52  ;;  %v683_v17 = vmax.f32 %v610_v28, 0.0  ;;  %v681_v43 = vmax.f32 %v604_v22, 0.0 }
 0x140   :  { %v615_v40 = vpop.f32.mrf.mxu0 }
 0x141   :  { %v616_v0 = vadd.f32 %v615_v40, %v256_v52  ;;  %v684_v19 = vmax.f32 %v614_v30, 0.0  ;;  %v592_v52 = vadd.f32 %v591_v55, %v236_v38  ;;  %v211_v40 = vpop.permute.xlu0 %210  ;;  %v673_v38 = vmax.f32 %v580_v41, 0.0 }
 0x142   :  { %v619_v35 = vpop.f32.mrf.mxu0  ;;  %v562_v34 = vadd.f32 %v3979_v29, %v211_v40 }
 0x143   :  { %v620_v37 = vadd.f32 %v619_v35, %v261_v54  ;;  %v685_v60 = vmax.f32 %v616_v0, 0.0  ;;  %v596_v35 = vadd.f32 %v595_v56, %v241_v1  ;;  %v578_v56 = vadd.f32 %v3995_v57, %v226_v21 }
 0x144   :  { %v621_v26 = vpop.f32.mrf.mxu0  ;;  %v676_v1 = vmax.f32 %v590_v2, 0.0 }
 0x145   :  { %v622_v31 = vadd.f32 %v621_v26, %v261_v54  ;;  %v686_v44 = vmax.f32 %v620_v37, 0.0  ;;  %v216_v54 = vpop.permute.xlu1 %215  ;;  %v678_v46 = vmax.f32 %v596_v35, 0.0  ;;  %v677_v37 = vmax.f32 %v592_v52, 0.0  ;;  %v201_v57 = vpop.permute.xlu0 %200 }
 0x146   :  { %v568_v10 = vadd.f32 %v3987_v23, %v216_v54  ;;  %v566_v13 = vadd.f32 %v3983_v33, %v216_v54  ;;  %v672_v26 = vmax.f32 %v578_v56, 0.0  ;;  %v550_v33 = vadd.f32 %v3963_v62, %v201_v57 }
 0x147   :  { %v687_v47 = vmax.f32 %v622_v31, 0.0  ;;  %v548_v29 = vadd.f32 %v3959_v20, %v201_v57  ;;  %v4817_v57 = vld [vmem:[#allocation21_spill] sm:$0xff] }
 0x148   :  { %v669_v21 = vmax.f32 %v568_v10, 0.0  ;;  %v668_v28 = vmax.f32 %v566_v13, 0.0  ;;  %v4813_v10 = vld [vmem:[#allocation17_spill] sm:$0xff]  ;;  %v4815_v13 = vld [vmem:[#allocation19_spill] sm:$0xff] }
 0x149   :  { %728 = vmatprep.subr.mxu1 %v687_v47  ;;  %v206_v55 = vpop.permute.xlu1 %205  ;;  %v667_v47 = vmax.f32 %v562_v34, 0.0  ;;  %v4818_v34 = vld [vmem:[#allocation24_spill] sm:$0xff] }
 0x14a   :  { %729 = vmatpush2.msra.mxu1 %v686_v44  ;;  %v556_v30 = vadd.f32 %v3971_v51, %v206_v55  ;;  %v554_v23 = vadd.f32 %v3967_v4, %v206_v55  ;;  %v4800_v55 = vld [vmem:[#allocation6_spill] sm:$0xff] }
 0x14b   :  { %730 = vmatprep.subr.mxu1 %v685_v60 }
 0x14c   :  { %731 = vmatpush2.msra.mxu1 %v684_v19  ;;  %v665_v22 = vmax.f32 %v556_v30, 0.0  ;;  %v664_v60 = vmax.f32 %v554_v23, 0.0  ;;  %v663_v19 = vmax.f32 %v550_v33, 0.0  ;;  %v4823_v30 = vld [vmem:[#allocation27_spill] sm:$0xff]  ;;  %v784_v23 = vlaneseq }
 0x14d   :  { %732 = vmatprep.subr.mxu1 %v683_v17  ;;  %v574_v17 = vadd.f32 %v3993_v42, %v221_v16  ;;  %v560_v42 = vadd.f32 %v3975_v39, %v211_v40  ;;  %v191_v39 = vpop.permute.xlu0 %190 }
 0x14e   :  { %733 = vmatpush2.msra.mxu1 %v682_v18  ;;  %v572_v18 = vadd.f32 %v3991_v59, %v221_v16  ;;  %v196_v59 = vpop.permute.xlu1 %195  ;;  %v538_v61 = vadd.f32 %v3951_v50, %v191_v39  ;;  %v536_v62 = vadd.f32 %v3949_v45, %v191_v39  ;;  %v662_v16 = vmax.f32 %v548_v29, 0.0  ;;  %v688_v45 = vld [vmem:[%s4732_s4] sm:$0xff] }
 0x14f   :  { %734 = vmatprep.subr.mxu1 %v681_v43  ;;  %v671_v0 = vmax.f32 %v574_v17, 0.0  ;;  %v666_v25 = vmax.f32 %v560_v42, 0.0  ;;  %v544_v44 = vadd.f32 %v3955_v24, %v196_v59  ;;  %v542_v51 = vadd.f32 %v3953_v53, %v196_v59  ;;  %v4801_v17 = vld [vmem:[#allocation5_spill] sm:$0xff]  ;;  %v4820_v42 = vld [vmem:[#allocation26_spill] sm:$0xff]  ;;  %v4822_v59 = vld [vmem:[#allocation28_spill] sm:$0xff] }
 0x150   :  { %735 = vmatpush2.msra.mxu1 %v680_v63  ;;  %v670_v31 = vmax.f32 %v572_v18, 0.0  ;;  %v659_v53 = vmax.f32 %v538_v61, 0.0  ;;  %v658_v54 = vmax.f32 %v536_v62, 0.0  ;;  %v4811_v18 = vld [vmem:[#allocation15_spill] sm:$0xff]  ;;  %v4092_v33 = vand.u32 127, %v784_v23  ;;  %v4098_v29 = vld [vmem:[%s4736_s8] sm:$0xff] }
 0x151   :  { %736 = vmatprep.subr.mxu1 %v679_v7  ;;  %v661_v58 = vmax.f32 %v544_v44, 0.0  ;;  %v660_v35 = vmax.f32 %v542_v51, 0.0  ;;  %v694_v43 = vpop.permute.xlu0 %693 }
 0x152   :  { %737 = vmatpush2.msra.mxu1 %v678_v46  ;;  %v186_v4 = vpop.permute.xlu1 %185  ;;  %vm804_vm2 = vcmp.lt.s32.totalorder %v4092_v33, 16  ;;  %vm786_vm3 = vcmp.lt.s32.totalorder %v4092_v33, 17  ;;  %vm983_vm4 = vcmp.lt.s32.totalorder %v4092_v33, 15  ;;  %vm1084_vm5 = vcmp.lt.s32.totalorder %v4092_v33, 1 }
 0x153   :  { %738 = vmatprep.subr.mxu1 %v677_v37  ;;  %v532_v20 = vadd.f32 %v3947_v27, %v186_v4  ;;  %v530_v24 = vadd.f32 %v3945_v36, %v186_v4  ;;  %v4799_v27 = vmov 0.0   ;;  %v37_v36 = vld [vmem:[%s4728_s0] sm:$0xff]  ;;  %vm1269_vm6 = vcmp.lt.s32.totalorder %v4092_v33, 127 }
 0x154   :  { %739 = vmatpush2.msra.mxu1 %v676_v1  ;;  %v768_v49 = vcombine.high %v37_v36, %v37_v36  ;;  %vm1370_vm7 = vcmp.lt.s32.totalorder %v4092_v33, 113  ;;  %vm1471_vm8 = vcmp.lt.s32.totalorder %v4092_v33, 112  ;;  %vm1572_vm9 = vcmp.lt.s32.totalorder %v4092_v33, 111  ;;  %v3458_v33 = vld [vmem:[%s4736_s8 + $0x10] ss:$0 sm:$0xff] }
 0x155   :  { %740 = vmatprep.subr.mxu1 %v675_v32  ;;  %v657_v52 = vmax.f32 %v532_v20, 0.0  ;;  %v656_v50 = vmax.f32 %v530_v24, 0.0  ;;  %v4802_v32 = vld [vmem:[#allocation8_spill] sm:$0xff] }
 0x156   :  { %741 = vmatpush2.msra.mxu1 %v674_v3  ;;  %v4812_v3 = vld [vmem:[#allocation18_spill] sm:$0xff] }
 0x157   :  { %742 = vmatprep.subr.mxu1 %v673_v38  ;;  %v4814_v38 = vld [vmem:[#allocation20_spill] sm:$0xff] }
 0x158   :  { %743 = vmatpush2.msra.mxu1 %v672_v26  ;;  %v4816_v26 = vld [vmem:[#allocation22_spill] sm:$0xff] }
 0x159   :  { %744 = vmatprep.subr.mxu1 %v671_v0  ;;  %v4819_v0 = vld [vmem:[#allocation23_spill] sm:$0xff] }
 0x15a   :  { %745 = vmatpush2.msra.mxu1 %v670_v31  ;;  %v4821_v31 = vld [vmem:[#allocation25_spill] sm:$0xff] }
 0x15b   :  { %746 = vmatprep.subr.mxu1 %v669_v21  ;;  %v4824_v21 = vld [vmem:[#allocation29_spill] sm:$0xff] }
 0x15c   :  { %747 = vmatpush2.msra.mxu1 %v668_v28  ;;  %v4090_v28 = vshrl.u32 %v784_v23, 7 }
 0x15d   :  { %748 = vmatprep.subr.mxu1 %v667_v47 }
 0x15e   :  { %749 = vmatpush2.msra.mxu1 %v666_v25  ;;  %v809_v47 = vsub.s32 1, %v4090_v28  ;;  %v4103_v25 = vld [vmem:[%s4736_s8 + $0x8] sm:$0xff]  ;;  %v791_v39 = vsub.s32 0, %v4090_v28  ;;  %v988_v24 = vsub.s32 2, %v4090_v28 }
 0x15f   :  { %750 = vmatprep.subr.mxu1 %v665_v22 }
 0x160   :  { %751 = vmatpush2.msra.mxu1 %v664_v60  ;;  %v4108_v22 = vrot.slane %v4098_v29, %v809_v47  ;;  %v4111_v51 = vrot.slane %v4103_v25, %v809_v47 }
 0x161   :  { %752 = vmatprep.subr.mxu1 %v663_v19  ;;  %v4119_v19 = vrot.slane %v4098_v29, %v791_v39 }
 0x162   :  { %753 = vmatpush2.msra.mxu1 %v662_v16 }
 0x163   :  { %754 = vmatprep.subr.mxu1 %v661_v58  ;;  %v4124_v58 = vrot.slane %v4103_v25, %v791_v39  ;;  %v3346_v39 = vld [vmem:[%s4734_s6 + $0x28] sm:$0xff] }
 0x164   :  { %755 = vmatpush2.msra.mxu1 %v660_v35  ;;  %v3327_v35 = vld [vmem:[%s4734_s6 + $0x8] sm:$0xff] }
 0x165   :  { %756 = vmatprep.subr.mxu1 %v659_v53 }
 0x166   :  { %757 = vmatpush2.msra.mxu1 %v658_v54 }
 0x167   :  { %758 = vmatprep.subr.mxu1 %v657_v52 }
 0x168   :  { %759 = vmatpush2.msra.mxu1 %v656_v50  ;;  %v1089_v50 = vsub.s32 3, %v4090_v28 }
 0x169   :  { %761 = vmatmul.mubr.f32.vlgmr.msra.gmra.mxu1 %v688_v45 }
 0x16a   :  { %892 = vmatprep.mubr.f32.mxu1 %v4799_v27 }
 0x229   :  { %v762_v2 = vpop.f32.mrf.mxu1 }
 0x22a   :  { %v763_v63 = vadd.f32 %v762_v2, %v694_v43  ;;  %v4142_v2 = vrot.slane %v4098_v29, %v988_v24 }
 0x22b   :  { %v764_v7 = vpop.f32.mrf.mxu1 }
 0x22c   :  { %v770_v48 = vmul.f32 %v763_v63, %v37_v36  ;;  %v774_v46 = vrot.slane %v763_v63, 4  ;;  %v765_v40 = vadd.f32 %v764_v7, %v694_v43  ;;  %v4145_v63 = vrot.slane %v4103_v25, %v988_v24 }
 0x22e   :  { %v4021_v41 = vadd.f32 %v774_v46, %v770_v48  ;;  %v771_v37 = vmul.f32 %v768_v49, %v765_v40  ;;  %v775_v56 = vrot.slane %v765_v40, 4  ;;  %4825 = vst [vmem:[#allocation6_spill] sm:$0xff] %v4145_v63  ;;  %v799_v49 = vld [vmem:[%s4734_s6] sm:$0xff]  ;;  %v4159_v40 = vrot.slane %v4098_v29, %v1089_v50 }
 0x230   :  { %v4023_v1 = vadd.f32 %v775_v56, %v771_v37  ;;  %800 = vrot.lane.b32.xlu1 %v4021_v41, %s3483_s17  ;;  %4826 = vst [vmem:[#allocation5_spill] sm:$0xff] %v4159_v40 }
 0x232   :  { %802 = vrot.lane.b32.xlu0 %v4023_v1, %s3483_s17 }
 0x234   :  { %780 = vrot.lane.b32.xlu1 %v4021_v41, %s3484_s18 }
 0x236   :  { %782 = vrot.lane.b32.xlu0 %v4023_v1, %s3484_s18 }
 0x238   :  { %979 = vrot.lane.b32.xlu1 %v4021_v41, %s3485_s19 }
 0x23a   :  { %981 = vrot.lane.b32.xlu0 %v4023_v1, %s3485_s19 }
 0x23c   :  { %1080 = vrot.lane.b32.xlu1 %v4021_v41, %s3486_s20 }
 0x23e   :  { %1082 = vrot.lane.b32.xlu0 %v4023_v1, %s3486_s20 }
 0x240   :  { %1265 = vrot.lane.b32.xlu1 %v4021_v41, %s3487_s21 }
 0x242   :  { %1267 = vrot.lane.b32.xlu0 %v4023_v1, %s3487_s21 }
 0x244   :  { %1366 = vrot.lane.b32.xlu1 %v4021_v41, %s3488_s22 }
 0x246   :  { %1368 = vrot.lane.b32.xlu0 %v4023_v1, %s3488_s22 }
 0x248   :  { %1467 = vrot.lane.b32.xlu1 %v4021_v41, %s3489_s23 }
 0x24a   :  { %1469 = vrot.lane.b32.xlu0 %v4023_v1, %s3489_s23 }
 0x24c   :  { %1568 = vrot.lane.b32.xlu1 %v4021_v41, %s3490_s24 }
 0x24e   :  { %1570 = vrot.lane.b32.xlu0 %v4023_v1, %s3490_s24 }
 0x250   :  { %1843 = vperm.xlu1 %3448, %v3560_v6   ;;  %v4803_v6 = vld [vmem:[#allocation7_spill] sm:$0xff] }
 0x252   :  { %1838 = vperm.xlu0 %3447, %v3577_v9   ;;  %v4804_v9 = vld [vmem:[#allocation10_spill] sm:$0xff] }
 0x254   :  { %1833 = vperm.xlu1 %3448, %v3555_v5   ;;  %v4805_v5 = vld [vmem:[#allocation9_spill] sm:$0xff] }
 0x256   :  { %1828 = vperm.xlu0 %3447, %v3572_v8   ;;  %v4806_v8 = vld [vmem:[#allocation12_spill] sm:$0xff] }
 0x258   :  { %1823 = vperm.xlu1 %3448, %v3594_v12   ;;  %v4807_v12 = vld [vmem:[#allocation11_spill] sm:$0xff] }
 0x25a   :  { %1818 = vperm.xlu0 %3447, %v3589_v11   ;;  %v4808_v11 = vld [vmem:[#allocation14_spill] sm:$0xff] }
 0x25c   :  { %1813 = vperm.xlu1 %3448, %v3611_v15   ;;  %v4809_v15 = vld [vmem:[#allocation13_spill] sm:$0xff] }
 0x25e   :  { %1808 = vperm.xlu0 %3447, %v3606_v14   ;;  %v4810_v14 = vld [vmem:[#allocation16_spill] sm:$0xff] }
 0x260   :  { %1803 = vperm.xlu1 %3448, %v4800_v55  }
 0x262   :  { %1798 = vperm.xlu0 %3447, %v4801_v17   ;;  %v4165_v17 = vrot.slane %v4103_v25, %v1089_v50 }
 0x264   :  { %1793 = vperm.xlu1 %3448, %v4802_v32   ;;  %4827 = vst [vmem:[#allocation8_spill] sm:$0xff] %v4165_v17  ;;  %v1274_v32 = vsub.s32 5, %v4090_v28 }
 0x266   :  { %1788 = vperm.xlu0 %3447, %v4803_v6   ;;  %v3334_v6 = vld [vmem:[%s4734_s6 + $0x10] sm:$0xff] }
 0x268   :  { %1783 = vperm.xlu1 %3448, %v4804_v9  }
 0x26a   :  { %1778 = vperm.xlu0 %3447, %v4805_v5  }
 0x26c   :  { %1773 = vperm.xlu1 %3448, %v4806_v8  }
 0x26e   :  { %1768 = vperm.xlu0 %3447, %v4807_v12  }
 0x270   :  { %1923 = vperm.xlu1 %3448, %v4808_v11  }
 0x272   :  { %1918 = vperm.xlu0 %3447, %v4809_v15  }
 0x274   :  { %1913 = vperm.xlu1 %3448, %v4810_v14   ;;  %v4183_v14 = vrot.slane %v4103_v25, %v1274_v32 }
 0x276   :  { %1908 = vperm.xlu0 %3447, %v4811_v18   ;;  %4828 = vst [vmem:[#allocation7_spill] sm:$0xff] %v4183_v14  ;;  %v1375_v18 = vsub.s32 6, %v4090_v28 }
 0x278   :  { %1903 = vperm.xlu1 %3448, %v4812_v3   ;;  %v3338_v3 = vld [vmem:[%s4734_s6 + $0x18] sm:$0xff] }
 0x27a   :  { %1898 = vperm.xlu0 %3447, %v4813_v10  }
 0x27c   :  { %1893 = vperm.xlu1 %3448, %v4814_v38  }
 0x27e   :  { %1888 = vperm.xlu0 %3447, %v4815_v13   ;;  %v4194_v13 = vrot.slane %v4098_v29, %v1274_v32  ;;  %v1707_v32 = vld [vmem:[%s4730_s2 + $0x28] sm:$0xff] }
 0x280   :  { %1883 = vperm.xlu1 %3448, %v4816_v26   ;;  %4829 = vst [vmem:[#allocation10_spill] sm:$0xff] %v4194_v13 }
 0x282   :  { %1878 = vperm.xlu0 %3447, %v4817_v57  }
 0x284   :  { %1873 = vperm.xlu1 %3448, %v4818_v34  }
 0x286   :  { %1868 = vperm.xlu0 %3447, %v4819_v0   ;;  %v4205_v0 = vrot.slane %v4103_v25, %v1375_v18 }
 0x288   :  { %1863 = vperm.xlu1 %3448, %v4820_v42   ;;  %4830 = vst [vmem:[#allocation9_spill] sm:$0xff] %v4205_v0  ;;  %v1476_v42 = vsub.s32 7, %v4090_v28 }
 0x28a   :  { %1858 = vperm.xlu0 %3447, %v4821_v31   ;;  %v3342_v31 = vld [vmem:[%s4734_s6 + $0x20] sm:$0xff]  ;;  %v4227_v47 = vrot.slane %v4103_v25, %v1476_v42 }
 0x28c   :  { %1853 = vperm.xlu1 %3448, %v4822_v59   ;;  %4832 = vst [vmem:[#allocation11_spill] sm:$0xff] %v4227_v47 }
 0x28e   :  { %1848 = vperm.xlu0 %3447, %v4823_v30  }
 0x290   :  { %2354 = vperm.xlu1 %3448, %v4824_v21   ;;  %v4219_v21 = vrot.slane %v4098_v29, %v1375_v18  ;;  %v1715_v18 = vld [vmem:[%s4730_s2 + $0x68] sm:$0xff] }
 0x292   :  { %4831 = vst [vmem:[#allocation12_spill] sm:$0xff] %v4219_v21 }
 0x2a2   :  { %v801_v44 = vpop.permute.xlu1 %800 }
 0x2a4   :  { %v803_v60 = vpop.permute.xlu0 %802 }
 0x2a5   :  { %v805_v4 = vsel %vm804_vm2, %v801_v44, %v803_v60  ;;  %v806_v61 = vsel %vm804_vm2, %v803_v60, %v801_v44 }
 0x2a6   :  { %v815_v62 = vmul.f32 %v4108_v22, %v806_v61  ;;  %v816_v16 = vmul.f32 %v4111_v51, %v805_v4  ;;  %v781_v20 = vpop.permute.xlu1 %780  ;;  %v4239_v61 = vrot.slane %v4098_v29, %v1476_v42  ;;  %v3350_v29 = vld [vmem:[%s4734_s6 + $0x30] sm:$0xff]  ;;  %v1722_v42 = vld [vmem:[%s4730_s2 + $0xa0] sm:$0xff] }
 0x2a8   :  { %v783_v53 = vpop.permute.xlu0 %782  ;;  %3328 = vmatprep.subr.msk.mxu1 %vm362_vm0, %v816_v16  ;;  %4833 = vst [vmem:[#allocation14_spill] sm:$0xff] %v4239_v61  ;;  %v3359_v16 = vld [vmem:[%s4736_s8 + $0x18] ss:$0 sm:$0xff] }
 0x2a9   :  { %v787_v54 = vsel %vm786_vm3, %v781_v20, %v783_v53  ;;  %v788_v52 = vsel %vm786_vm3, %v783_v53, %v781_v20  ;;  %3329 = vmatpush1.msk.msra.mxu1 %vm362_vm0, %v815_v62 }
 0x2aa   :  { %v797_v45 = vmul.f32 %v4119_v19, %v788_v52  ;;  %v798_v36 = vmul.f32 %v4124_v58, %v787_v54  ;;  %v980_v43 = vpop.permute.xlu1 %979  ;;  %3330 = vmatmul.mubr.msk.f32.vlgmr.msra.gmra.mxu1 %vm265_vm1, %v3327_v35  ;;  %v3365_v54 = vld [vmem:[%s4729_s1 + $0x8] sm:$0xff]  ;;  %v3358_v52 = vld [vmem:[%s4736_s8 + $0x10] ss:$0 sm:$0xff] }
 0x2ab   :  { %972 = vmatprep.mubr.f32.mxu1 %v4799_v27 }
 0x2ac   :  { %v982_v7 = vpop.permute.xlu0 %981  ;;  %3331 = vmatprep.subr.msk.mxu1 %vm362_vm0, %v798_v36  ;;  %v3354_v36 = vld [vmem:[%s4734_s6 + $0x38] sm:$0xff] }
 0x2ad   :  { %v984_v48 = vsel %vm983_vm4, %v980_v43, %v982_v7  ;;  %v985_v46 = vsel %vm983_vm4, %v982_v7, %v980_v43  ;;  %3332 = vmatpush1.msk.msra.mxu1 %vm362_vm0, %v797_v45  ;;  %v1927_v43 = vcombine.high %v3365_v54, %v3365_v54  ;;  %v3360_v7 = vld [vmem:[%s4734_s6 + $0x40] sm:$0xff] }
 0x2ae   :  { %v994_v37 = vmul.f32 %v4142_v2, %v985_v46  ;;  %v995_v56 = vmul.f32 %v4145_v63, %v984_v48  ;;  %v1081_v55 = vpop.permute.xlu1 %1080  ;;  %3333 = vmatmul.mubr.msk.f32.vlgmr.msra.gmra.mxu1 %vm265_vm1, %v799_v49  ;;  %v1702_v48 = vld [vmem:[%s4730_s2] sm:$0xff]  ;;  %v1703_v46 = vld [vmem:[%s4730_s2 + $0x8] sm:$0xff] }
 0x2af   :  { %1071 = vmatprep.mubr.f32.mxu1 %v4799_v27 }
 0x2b0   :  { %v1083_v9 = vpop.permute.xlu0 %1082  ;;  %3335 = vmatprep.subr.msk.mxu1 %vm362_vm0, %v995_v56  ;;  %v1705_v56 = vld [vmem:[%s4730_s2 + $0x18] sm:$0xff] }
 0x2b1   :  { %v1085_v5 = vsel %vm1084_vm5, %v1081_v55, %v1083_v9  ;;  %v1086_v8 = vsel %vm1084_vm5, %v1083_v9, %v1081_v55  ;;  %3336 = vmatpush1.msk.msra.mxu1 %vm362_vm0, %v994_v37  ;;  %v1704_v37 = vld [vmem:[%s4730_s2 + $0x10] sm:$0xff]  ;;  %v1706_v55 = vld [vmem:[%s4730_s2 + $0x20] sm:$0xff]  ;;  %v1709_v9 = vld [vmem:[%s4730_s2 + $0x38] sm:$0xff] }
 0x2b2   :  { %v1095_v12 = vmul.f32 %v4159_v40, %v1086_v8  ;;  %v1096_v11 = vmul.f32 %v4165_v17, %v1085_v5  ;;  %v1266_v15 = vpop.permute.xlu1 %1265  ;;  %3337 = vmatmul.mubr.msk.f32.vlgmr.msra.gmra.mxu1 %vm265_vm1, %v3334_v6  ;;  %v1708_v6 = vld [vmem:[%s4730_s2 + $0x30] sm:$0xff]  ;;  %v1710_v5 = vld [vmem:[%s4730_s2 + $0x40] sm:$0xff]  ;;  %v1711_v8 = vld [vmem:[%s4730_s2 + $0x48] sm:$0xff] }
 0x2b3   :  { %1172 = vmatprep.mubr.f32.mxu1 %v4799_v27 }
 0x2b4   :  { %v1268_v10 = vpop.permute.xlu0 %1267  ;;  %3339 = vmatprep.subr.msk.mxu1 %vm362_vm0, %v1096_v11  ;;  %v1713_v11 = vld [vmem:[%s4730_s2 + $0x58] sm:$0xff] }
 0x2b5   :  { %v1271_v38 = vsel %vm1269_vm6, %v1268_v10, %v1266_v15  ;;  %3340 = vmatpush1.msk.msra.mxu1 %vm362_vm0, %v1095_v12  ;;  %v1270_v26 = vsel %vm1269_vm6, %v1266_v15, %v1268_v10  ;;  %v1712_v12 = vld [vmem:[%s4730_s2 + $0x50] sm:$0xff]  ;;  %v1714_v15 = vld [vmem:[%s4730_s2 + $0x60] sm:$0xff]  ;;  %v1717_v10 = vld [vmem:[%s4730_s2 + $0x78] sm:$0xff] }
 0x2b6   :  { %v1281_v57 = vmul.f32 %v4183_v14, %v1271_v38  ;;  %v1367_v34 = vpop.permute.xlu1 %1366  ;;  %3341 = vmatmul.mubr.msk.f32.vlgmr.msra.gmra.mxu1 %vm265_vm1, %v3338_v3  ;;  %3343 = vmatprep.subr.msk.mxu1 %vm362_vm0, %v4023_v1  ;;  %v1280_v30 = vmul.f32 %v4194_v13, %v1270_v26  ;;  %v1716_v3 = vld [vmem:[%s4730_s2 + $0x70] sm:$0xff]  ;;  %v1718_v38 = vld [vmem:[%s4730_s2 + $0x80] sm:$0xff]  ;;  %v1719_v26 = vld [vmem:[%s4730_s2 + $0x88] sm:$0xff] }
 0x2b7   :  { %3344 = vmatpush1.msk.msra.mxu1 %vm362_vm0, %v4021_v41  ;;  %1256 = vmatprep.mubr.f32.mxu1 %v4799_v27 }
 0x2b8   :  { %v1369_v59 = vpop.permute.xlu0 %1368  ;;  %3347 = vmatprep.subr.msk.mxu1 %vm362_vm0, %v1281_v57  ;;  %v1720_v57 = vld [vmem:[%s4730_s2 + $0x90] sm:$0xff] }
 0x2b9   :  { %v1372_v1 = vsel %vm1370_vm7, %v1369_v59, %v1367_v34  ;;  %v1371_v41 = vsel %vm1370_vm7, %v1367_v34, %v1369_v59  ;;  %v1721_v34 = vld [vmem:[%s4730_s2 + $0x98] sm:$0xff]  ;;  %v1724_v59 = vld [vmem:[%s4730_s2 + $0xb0] sm:$0xff] }
 0x2ba   :  { %v1382_v23 = vmul.f32 %v4205_v0, %v1372_v1  ;;  %v1468_v28 = vpop.permute.xlu1 %1467  ;;  %3345 = vmatmul.mubr.msk.f32.vlgmr.msra.gmra.mxu1 %vm265_vm1, %v3342_v31  ;;  %v1381_v60 = vmul.f32 %v4219_v21, %v1371_v41  ;;  %v1723_v31 = vld [vmem:[%s4730_s2 + $0xa8] sm:$0xff]  ;;  %v1726_v1 = vld [vmem:[%s4730_s2 + $0xc0] sm:$0xff] }
 0x2bb   :  { %3348 = vmatpush1.msk.msra.mxu1 %vm362_vm0, %v1280_v30  ;;  %1357 = vmatprep.mubr.f32.mxu1 %v4799_v27  ;;  %v1725_v30 = vld [vmem:[%s4730_s2 + $0xb8] sm:$0xff]  ;;  %v1727_v41 = vld [vmem:[%s4730_s2 + $0xc8] sm:$0xff] }
 0x2bc   :  { %v1470_v44 = vpop.permute.xlu0 %1469  ;;  %3351 = vmatprep.subr.msk.mxu1 %vm362_vm0, %v1382_v23  ;;  %v1728_v23 = vld [vmem:[%s4730_s2 + $0xd0] sm:$0xff] }
 0x2bd   :  { %v1473_v4 = vsel %vm1471_vm8, %v1470_v44, %v1468_v28  ;;  %v1472_v25 = vsel %vm1471_vm8, %v1468_v28, %v1470_v44  ;;  %v1729_v28 = vld [vmem:[%s4730_s2 + $0xd8] sm:$0xff]  ;;  %v1731_v44 = vld [vmem:[%s4730_s2 + $0xe8] sm:$0xff] }
 0x2be   :  { %v1483_v62 = vmul.f32 %v4227_v47, %v1473_v4  ;;  %3349 = vmatmul.mubr.msk.f32.vlgmr.msra.gmra.mxu1 %vm265_vm1, %v3346_v39  ;;  %v1569_v20 = vpop.permute.xlu1 %1568  ;;  %v1482_v35 = vmul.f32 %v4239_v61, %v1472_v25  ;;  %v1730_v39 = vld [vmem:[%s4730_s2 + $0xe0] sm:$0xff]  ;;  %v1733_v4 = vld [vmem:[%s4730_s2 + $0xf8] sm:$0xff] }
 0x2bf   :  { %3352 = vmatpush1.msk.msra.mxu1 %vm362_vm0, %v1381_v60  ;;  %1458 = vmatprep.mubr.f32.mxu1 %v4799_v27  ;;  %v1732_v60 = vld [vmem:[%s4730_s2 + $0xf0] sm:$0xff] }
 0x2c0   :  { %v1571_v24 = vpop.permute.xlu0 %1570  ;;  %3355 = vmatprep.subr.msk.mxu1 %vm362_vm0, %v1483_v62 }
 0x2c1   :  { %v1574_v53 = vsel %vm1572_vm9, %v1571_v24, %v1569_v20  ;;  %v1573_v50 = vsel %vm1572_vm9, %v1569_v20, %v1571_v24 }
 0x2c2   :  { %v1584_v45 = vmul.f32 %v3359_v16, %v1574_v53  ;;  %3353 = vmatmul.mubr.msk.f32.vlgmr.msra.gmra.mxu1 %vm265_vm1, %v3350_v29  ;;  %v1583_v49 = vmul.f32 %v3358_v52, %v1573_v50 }
 0x2c3   :  { %3356 = vmatpush1.msk.msra.mxu1 %vm362_vm0, %v1482_v35  ;;  %1559 = vmatprep.mubr.f32.mxu1 %v4799_v27 }
 0x2c4   :  { %3361 = vmatprep.subr.msk.mxu1 %vm362_vm0, %v1584_v45 }
 0x2c6   :  { %3357 = vmatmul.mubr.msk.f32.vlgmr.msra.gmra.mxu1 %vm265_vm1, %v3354_v36 }
 0x2c7   :  { %3362 = vmatpush1.msk.msra.mxu1 %vm362_vm0, %v1583_v49  ;;  %1660 = vmatprep.mubr.f32.mxu1 %v4799_v27 }
 0x2c8   :  { %3366 = vmatprep.subr.msk.mxu1 %vm362_vm0, %v1927_v43 }
 0x2ca   :  { %3363 = vmatmul.mubr.msk.f32.vlgmr.msra.gmra.mxu1 %vm265_vm1, %v3360_v7 }
 0x2cb   :  { %3367 = vmatpush1.msk.msra.mxu1 %vm362_vm0, %v3365_v54  ;;  %2092 = vmatprep.mubr.f32.mxu1 %v4799_v27 }
 0x2ce   :  { %3368 = vmatmul.mubr.msk.f32.vlgmr.msra.gmra.mxu1 %vm265_vm1, %v1702_v48 }
 0x2cf   :  { %2098 = vmatprep.mubr.f32.mxu1 %v4799_v27 }
 0x2d2   :  { %3369 = vmatmul.mubr.msk.f32.gmra.mxu1 %vm265_vm1, %v1703_v46 }
 0x2d3   :  { %2104 = vmatprep.mubr.f32.mxu1 %v4799_v27 }
 0x2d6   :  { %3370 = vmatmul.mubr.msk.f32.gmra.mxu1 %vm265_vm1, %v1704_v37 }
 0x2d7   :  { %2110 = vmatprep.mubr.f32.mxu1 %v4799_v27 }
 0x2da   :  { %3371 = vmatmul.mubr.msk.f32.gmra.mxu1 %vm265_vm1, %v1705_v56 }
 0x2db   :  { %2116 = vmatprep.mubr.f32.mxu1 %v4799_v27 }
 0x2de   :  { %3372 = vmatmul.mubr.msk.f32.gmra.mxu1 %vm265_vm1, %v1706_v55 }
 0x2df   :  { %2122 = vmatprep.mubr.f32.mxu1 %v4799_v27 }
 0x2e2   :  { %3373 = vmatmul.mubr.msk.f32.gmra.mxu1 %vm265_vm1, %v1707_v32 }
 0x2e3   :  { %2128 = vmatprep.mubr.f32.mxu1 %v4799_v27 }
 0x2e6   :  { %3374 = vmatmul.mubr.msk.f32.gmra.mxu1 %vm265_vm1, %v1708_v6 }
 0x2e7   :  { %2134 = vmatprep.mubr.f32.mxu1 %v4799_v27 }
 0x2ea   :  { %3375 = vmatmul.mubr.msk.f32.gmra.mxu1 %vm265_vm1, %v1709_v9 }
 0x2eb   :  { %2140 = vmatprep.mubr.f32.mxu1 %v4799_v27 }
 0x2ee   :  { %3376 = vmatmul.mubr.msk.f32.gmra.mxu1 %vm265_vm1, %v1710_v5 }
 0x2ef   :  { %2146 = vmatprep.mubr.f32.mxu1 %v4799_v27 }
 0x2f2   :  { %3377 = vmatmul.mubr.msk.f32.gmra.mxu1 %vm265_vm1, %v1711_v8 }
 0x2f3   :  { %2152 = vmatprep.mubr.f32.mxu1 %v4799_v27 }
 0x2f6   :  { %3378 = vmatmul.mubr.msk.f32.gmra.mxu1 %vm265_vm1, %v1712_v12 }
 0x2f7   :  { %2158 = vmatprep.mubr.f32.mxu1 %v4799_v27 }
 0x2fa   :  { %3379 = vmatmul.mubr.msk.f32.gmra.mxu1 %vm265_vm1, %v1713_v11 }
 0x2fb   :  { %2164 = vmatprep.mubr.f32.mxu1 %v4799_v27 }
 0x2fe   :  { %3380 = vmatmul.mubr.msk.f32.gmra.mxu1 %vm265_vm1, %v1714_v15 }
 0x2ff   :  { %2170 = vmatprep.mubr.f32.mxu1 %v4799_v27 }
 0x302   :  { %3381 = vmatmul.mubr.msk.f32.gmra.mxu1 %vm265_vm1, %v1715_v18 }
 0x303   :  { %2176 = vmatprep.mubr.f32.mxu1 %v4799_v27 }
 0x306   :  { %3382 = vmatmul.mubr.msk.f32.gmra.mxu1 %vm265_vm1, %v1716_v3 }
 0x307   :  { %2182 = vmatprep.mubr.f32.mxu1 %v4799_v27 }
 0x30a   :  { %3383 = vmatmul.mubr.msk.f32.gmra.mxu1 %vm265_vm1, %v1717_v10 }
 0x30b   :  { %2188 = vmatprep.mubr.f32.mxu1 %v4799_v27 }
 0x30e   :  { %3384 = vmatmul.mubr.msk.f32.gmra.mxu1 %vm265_vm1, %v1718_v38 }
 0x30f   :  { %2194 = vmatprep.mubr.f32.mxu1 %v4799_v27 }
 0x312   :  { %3385 = vmatmul.mubr.msk.f32.gmra.mxu1 %vm265_vm1, %v1719_v26 }
 0x313   :  { %2200 = vmatprep.mubr.f32.mxu1 %v4799_v27 }
 0x316   :  { %3386 = vmatmul.mubr.msk.f32.gmra.mxu1 %vm265_vm1, %v1720_v57 }
 0x317   :  { %2206 = vmatprep.mubr.f32.mxu1 %v4799_v27 }
 0x31a   :  { %3387 = vmatmul.mubr.msk.f32.gmra.mxu1 %vm265_vm1, %v1721_v34 }
 0x31b   :  { %2212 = vmatprep.mubr.f32.mxu1 %v4799_v27 }
 0x31e   :  { %3388 = vmatmul.mubr.msk.f32.gmra.mxu1 %vm265_vm1, %v1722_v42 }
 0x31f   :  { %2218 = vmatprep.mubr.f32.mxu1 %v4799_v27 }
 0x322   :  { %3389 = vmatmul.mubr.msk.f32.gmra.mxu1 %vm265_vm1, %v1723_v31 }
 0x323   :  { %2224 = vmatprep.mubr.f32.mxu1 %v4799_v27 }
 0x326   :  { %3390 = vmatmul.mubr.msk.f32.gmra.mxu1 %vm265_vm1, %v1724_v59 }
 0x327   :  { %2230 = vmatprep.mubr.f32.mxu1 %v4799_v27 }
 0x32a   :  { %3391 = vmatmul.mubr.msk.f32.gmra.mxu1 %vm265_vm1, %v1725_v30 }
 0x32b   :  { %2236 = vmatprep.mubr.f32.mxu1 %v4799_v27 }
 0x32e   :  { %3392 = vmatmul.mubr.msk.f32.gmra.mxu1 %vm265_vm1, %v1726_v1 }
 0x32f   :  { %2242 = vmatprep.mubr.f32.mxu1 %v4799_v27 }
 0x332   :  { %3393 = vmatmul.mubr.msk.f32.gmra.mxu1 %vm265_vm1, %v1727_v41 }
 0x333   :  { %2248 = vmatprep.mubr.f32.mxu1 %v4799_v27 }
 0x336   :  { %3394 = vmatmul.mubr.msk.f32.gmra.mxu1 %vm265_vm1, %v1728_v23 }
 0x337   :  { %2254 = vmatprep.mubr.f32.mxu1 %v4799_v27 }
 0x33a   :  { %3395 = vmatmul.mubr.msk.f32.gmra.mxu1 %vm265_vm1, %v1729_v28 }
 0x33b   :  { %2260 = vmatprep.mubr.f32.mxu1 %v4799_v27 }
 0x33e   :  { %3396 = vmatmul.mubr.msk.f32.gmra.mxu1 %vm265_vm1, %v1730_v39 }
 0x33f   :  { %2266 = vmatprep.mubr.f32.mxu1 %v4799_v27 }
 0x342   :  { %3397 = vmatmul.mubr.msk.f32.gmra.mxu1 %vm265_vm1, %v1731_v44 }
 0x343   :  { %2272 = vmatprep.mubr.f32.mxu1 %v4799_v27 }
 0x346   :  { %3398 = vmatmul.mubr.msk.f32.gmra.mxu1 %vm265_vm1, %v1732_v60 }
 0x347   :  { %2278 = vmatprep.mubr.f32.mxu1 %v4799_v27 }
 0x34a   :  { %3399 = vmatmul.mubr.msk.f32.gmra.mxu1 %vm265_vm1, %v1733_v4 }
 0x36a   :  { %v894_v25 = vpop.f32.mrf.mxu1 }
 0x36c   :  { %v896_v62 = vpop.f32.mrf.mxu1 }
 0x36e   :  { %v974_v16 = vpop.f32.mrf.mxu1 }
 0x36f   :  { %v975_v29 = vadd.f32 %v974_v16, %v894_v25 }
 0x370   :  { %v976_v20 = vpop.f32.mrf.mxu1 }
 0x371   :  { %v977_v24 = vadd.f32 %v976_v20, %v896_v62  ;;  %v2350_v20 = vld [vmem:[%s4732_s4 + $0x8] sm:$0xff] }
 0x372   :  { %v1073_v35 = vpop.f32.mrf.mxu1  ;;  %2421 = vmatprep.mubr.f32.mxu0 %v2350_v20 }
 0x373   :  { %v1078_v53 = vadd.f32 %v1073_v35, %v975_v29 }
 0x374   :  { %v1075_v54 = vpop.f32.mrf.mxu1 }
 0x375   :  { %v1079_v52 = vadd.f32 %v1075_v54, %v977_v24 }
 0x376   :  { %v1174_v50 = vpop.f32.mrf.mxu1 }
 0x377   :  { %v1179_v45 = vadd.f32 %v1174_v50, %v1078_v53  ;;  %v1844_v50 = vpop.permute.xlu1 %1843 }
 0x378   :  { %v1176_v36 = vpop.f32.mrf.mxu1 }
 0x379   :  { %v1180_v43 = vadd.f32 %v1176_v36, %v1079_v52  ;;  %v1839_v36 = vpop.permute.xlu0 %1838 }
 0x37a   :  { %v1258_v49 = vpop.f32.mrf.mxu1 }
 0x37b   :  { %v1263_v7 = vadd.f32 %v1258_v49, %v1179_v45 }
 0x37c   :  { %v1260_v48 = vpop.f32.mrf.mxu1 }
 0x37d   :  { %v1264_v46 = vadd.f32 %v1260_v48, %v1180_v43 }
 0x37e   :  { %v1359_v37 = vpop.f32.mrf.mxu1 }
 0x37f   :  { %v1364_v56 = vadd.f32 %v1359_v37, %v1263_v7  ;;  %v1834_v7 = vpop.permute.xlu1 %1833 }
 0x380   :  { %v1361_v55 = vpop.f32.mrf.mxu1 }
 0x381   :  { %v1365_v32 = vadd.f32 %v1361_v55, %v1264_v46  ;;  %v1829_v46 = vpop.permute.xlu0 %1828 }
 0x382   :  { %v1460_v6 = vpop.f32.mrf.mxu1 }
 0x383   :  { %v1465_v9 = vadd.f32 %v1460_v6, %v1364_v56  ;;  %v1824_v55 = vpop.permute.xlu1 %1823 }
 0x384   :  { %v1462_v5 = vpop.f32.mrf.mxu1 }
 0x385   :  { %v1466_v8 = vadd.f32 %v1462_v5, %v1365_v32  ;;  %v1819_v6 = vpop.permute.xlu0 %1818 }
 0x386   :  { %v1561_v12 = vpop.f32.mrf.mxu1 }
 0x387   :  { %v1566_v11 = vadd.f32 %v1561_v12, %v1465_v9 }
 0x388   :  { %v1563_v15 = vpop.f32.mrf.mxu1 }
 0x389   :  { %v1567_v18 = vadd.f32 %v1563_v15, %v1466_v8  ;;  %v1814_v15 = vpop.permute.xlu1 %1813  ;;  %v1809_v61 = vpop.permute.xlu0 %1808 }
 0x38a   :  { %v1662_v3 = vpop.f32.mrf.mxu1 }
 0x38b   :  { %v4442_v10 = vadd.f32 %v1662_v3, %v1566_v11 }
 0x38c   :  { %v1664_v38 = vpop.f32.mrf.mxu1 }
 0x38d   :  { %v4444_v26 = vadd.f32 %v1664_v38, %v1567_v18 }
 0x38e   :  { %v4446_v57 = vpop.f32.mrf.mxu1 }
 0x390   :  { %v4448_v34 = vpop.f32.mrf.mxu1 }
 0x392   :  { %v4450_v42 = vpop.f32.mrf.mxu1 }
 0x394   :  { %v4452_v31 = vpop.f32.mrf.mxu1 }
 0x396   :  { %v4454_v59 = vpop.f32.mrf.mxu1 }
 0x398   :  { %v4456_v30 = vpop.f32.mrf.mxu1 }
 0x39a   :  { %v4458_v1 = vpop.f32.mrf.mxu1 }
 0x39c   :  { %v4460_v41 = vpop.f32.mrf.mxu1 }
 0x39e   :  { %v4462_v23 = vpop.f32.mrf.mxu1 }
 0x3a0   :  { %v4464_v28 = vpop.f32.mrf.mxu1 }
 0x3a2   :  { %v4466_v39 = vpop.f32.mrf.mxu1 }
 0x3a4   :  { %v4468_v44 = vpop.f32.mrf.mxu1 }
 0x3a6   :  { %v4470_v60 = vpop.f32.mrf.mxu1 }
 0x3a8   :  { %v4472_v4 = vpop.f32.mrf.mxu1 }
 0x3aa   :  { %v4474_v25 = vpop.f32.mrf.mxu1 }
 0x3ac   :  { %v4476_v62 = vpop.f32.mrf.mxu1 }
 0x3ae   :  { %v4478_v16 = vpop.f32.mrf.mxu1 }
 0x3b0   :  { %v4480_v29 = vpop.f32.mrf.mxu1 }
 0x3b2   :  { %v2148_v24 = vpop.f32.mrf.mxu1 }
 0x3b4   :  { %v2150_v35 = vpop.f32.mrf.mxu1 }
 0x3b6   :  { %v2154_v53 = vpop.f32.mrf.mxu1 }
 0x3b8   :  { %v2156_v54 = vpop.f32.mrf.mxu1 }
 0x3ba   :  { %v2160_v52 = vpop.f32.mrf.mxu1 }
 0x3bc   :  { %v2162_v45 = vpop.f32.mrf.mxu1 }
 0x3be   :  { %v2166_v43 = vpop.f32.mrf.mxu1 }
 0x3bf   :  { %v2167_v17 = vadd.f32 %v2166_v43, %v1829_v46 }
 0x3c0   :  { %v2168_v49 = vpop.f32.mrf.mxu1 }
 0x3c1   :  { %v2169_v13 = vadd.f32 %v2168_v49, %v1829_v46  ;;  %v1799_v49 = vpop.permute.xlu0 %1798  ;;  %v2151_v46 = vadd.f32 %v2150_v35, %v1814_v15 }
 0x3c2   :  { %v2172_v48 = vpop.f32.mrf.mxu1 }
 0x3c3   :  { %v2173_v47 = vadd.f32 %v2172_v48, %v1834_v7  ;;  %v2310_v48 = vmax.f32 %v2169_v13, 0.0 }
 0x3c4   :  { %v2174_v37 = vpop.f32.mrf.mxu1 }
 0x3c5   :  { %v2175_v38 = vadd.f32 %v2174_v37, %v1834_v7  ;;  %v2311_v37 = vmax.f32 %v2173_v47, 0.0  ;;  %v2157_v7 = vadd.f32 %v2156_v54, %v1819_v6  ;;  %v2145_v47 = vadd.f32 %v4480_v29, %v1809_v61 }
 0x3c6   :  { %v2178_v56 = vpop.f32.mrf.mxu1  ;;  %v2143_v54 = vadd.f32 %v4478_v16, %v1809_v61  ;;  %v2133_v29 = vadd.f32 %v4472_v4, %v1799_v49  ;;  %v2131_v61 = vadd.f32 %v4470_v60, %v1799_v49 }
 0x3c7   :  { %v2179_v18 = vadd.f32 %v2178_v56, %v1839_v36  ;;  %v2161_v56 = vadd.f32 %v2160_v52, %v1824_v55  ;;  %v2304_v52 = vmax.f32 %v2151_v46, 0.0 }
 0x3c8   :  { %v2180_v32 = vpop.f32.mrf.mxu1  ;;  %v2301_v16 = vmax.f32 %v2143_v54, 0.0 }
 0x3c9   :  { %v2181_v12 = vadd.f32 %v2180_v32, %v1839_v36  ;;  %v2313_v40 = vmax.f32 %v2179_v18, 0.0  ;;  %v2312_v32 = vmax.f32 %v2175_v38, 0.0  ;;  %v1804_v36 = vpop.permute.xlu1 %1803  ;;  %v2302_v18 = vmax.f32 %v2145_v47, 0.0 }
 0x3ca   :  { %v2184_v9 = vpop.f32.mrf.mxu1  ;;  %v2139_v35 = vadd.f32 %v4476_v62, %v1804_v36 }
 0x3cb   :  { %v2185_v5 = vadd.f32 %v2184_v9, %v1844_v50  ;;  %v2314_v14 = vmax.f32 %v2181_v12, 0.0  ;;  %v2309_v12 = vmax.f32 %v2167_v17, 0.0 }
 0x3cc   :  { %v2186_v8 = vpop.f32.mrf.mxu1 }
 0x3cd   :  { %v2187_v11 = vadd.f32 %v2186_v8, %v1844_v50  ;;  %v2315_v21 = vmax.f32 %v2185_v5, 0.0  ;;  %v2163_v50 = vadd.f32 %v2162_v45, %v1824_v55  ;;  %v2155_v5 = vadd.f32 %v2154_v53, %v1819_v6  ;;  %v1794_v13 = vpop.permute.xlu1 %1793 }
 0x3ce   :  { %v4485_v3 = vpop.f32.mrf.mxu1  ;;  %v2149_v45 = vadd.f32 %v2148_v24, %v1814_v15  ;;  %v1789_v24 = vpop.permute.xlu0 %1788  ;;  %v2137_v55 = vadd.f32 %v4474_v25, %v1804_v36  ;;  %v2127_v62 = vadd.f32 %v4468_v44, %v1794_v13  ;;  %v2125_v25 = vadd.f32 %v4466_v39, %v1794_v13 }
 0x3cf   :  { %v2316_v20 = vmax.f32 %v2187_v11, 0.0  ;;  %v2305_v53 = vmax.f32 %v2155_v5, 0.0  ;;  %v2121_v4 = vadd.f32 %v4464_v28, %v1789_v24 }
 0x3d0   :  { %v4487_v0 = vpop.f32.mrf.mxu1  ;;  %v2303_v6 = vmax.f32 %v2149_v45, 0.0  ;;  %v2296_v49 = vmax.f32 %v2127_v62, 0.0  ;;  %v2295_v5 = vmax.f32 %v2125_v25, 0.0 }
 0x3d1   :  { %2357 = vmatprep.subr.mxu0 %v2316_v20  ;;  %v2300_v20 = vmax.f32 %v2139_v35, 0.0  ;;  %v2294_v46 = vmax.f32 %v2121_v4, 0.0 }
 0x3d2   :  { %v4489_v9 = vpop.f32.mrf.mxu1  ;;  %2358 = vmatpush1.msra.mxu0 %v2315_v21  ;;  %v2308_v21 = vmax.f32 %v2163_v50, 0.0  ;;  %v1784_v50 = vpop.permute.xlu1 %1783 }
 0x3d3   :  { %2359 = vmatprep.subr.mxu0 %v2314_v14  ;;  %v2307_v14 = vmax.f32 %v2161_v56, 0.0  ;;  %v2298_v56 = vmax.f32 %v2133_v29, 0.0  ;;  %v1779_v60 = vpop.permute.xlu0 %1778  ;;  %v2115_v44 = vadd.f32 %v4460_v41, %v1784_v50  ;;  %v2113_v39 = vadd.f32 %v4458_v1, %v1784_v50 }
 0x3d4   :  { %v4491_v8 = vpop.f32.mrf.mxu1  ;;  %2360 = vmatpush1.msra.mxu0 %v2313_v40  ;;  %v2306_v40 = vmax.f32 %v2157_v7, 0.0  ;;  %v2297_v7 = vmax.f32 %v2131_v61, 0.0  ;;  %v2109_v28 = vadd.f32 %v4456_v30, %v1779_v60 }
 0x3d5   :  { %2361 = vmatprep.subr.mxu0 %v2312_v32  ;;  %v2299_v32 = vmax.f32 %v2137_v55, 0.0  ;;  %v2292_v47 = vmax.f32 %v2115_v44, 0.0  ;;  %v2291_v13 = vmax.f32 %v2113_v39, 0.0 }
 0x3d6   :  { %v4493_v43 = vpop.f32.mrf.mxu1  ;;  %2362 = vmatpush1.msra.mxu0 %v2311_v37  ;;  %v2119_v37 = vadd.f32 %v4462_v23, %v1789_v24  ;;  %v2107_v23 = vadd.f32 %v4454_v59, %v1779_v60 }
 0x3d7   :  { %2363 = vmatprep.subr.mxu0 %v2310_v48  ;;  %v1769_v1 = vpop.permute.xlu0 %1768 }
 0x3d8   :  { %v4495_v11 = vpop.f32.mrf.mxu1  ;;  %2364 = vmatpush1.msra.mxu0 %v2309_v12  ;;  %v2293_v45 = vmax.f32 %v2119_v37, 0.0  ;;  %v2097_v30 = vadd.f32 %v4448_v34, %v1769_v1  ;;  %v2095_v59 = vadd.f32 %v4446_v57, %v1769_v1  ;;  %v2289_v35 = vmax.f32 %v2107_v23, 0.0 }
 0x3d9   :  { %2365 = vmatprep.subr.mxu0 %v2308_v21  ;;  %v1774_v21 = vpop.permute.xlu1 %1773 }
 0x3da   :  { %v4499_v17 = vpop.f32.mrf.mxu1  ;;  %2366 = vmatpush1.msra.mxu0 %v2307_v14  ;;  %v2103_v41 = vadd.f32 %v4452_v31, %v1774_v21 }
 0x3db   :  { %2367 = vmatprep.subr.mxu0 %v2306_v40  ;;  %v2101_v40 = vadd.f32 %v4450_v42, %v1774_v21  ;;  %v2286_v42 = vmax.f32 %v2097_v30, 0.0  ;;  %v1919_v25 = vpop.permute.xlu0 %1918 }
 0x3dc   :  { %v4503_v15 = vpop.f32.mrf.mxu1  ;;  %2368 = vmatpush1.msra.mxu0 %v2305_v53  ;;  %v2290_v53 = vmax.f32 %v2109_v28, 0.0  ;;  %v2288_v31 = vmax.f32 %v2103_v41, 0.0 }
 0x3dd   :  { %2369 = vmatprep.subr.mxu0 %v2304_v52  ;;  %v2287_v24 = vmax.f32 %v2101_v40, 0.0 }
 0x3de   :  { %v4507_v38 = vpop.f32.mrf.mxu1  ;;  %2370 = vmatpush1.msra.mxu0 %v2303_v6  ;;  %v2285_v6 = vmax.f32 %v2095_v59, 0.0 }
 0x3df   :  { %2371 = vmatprep.subr.mxu0 %v2302_v18  ;;  %v1909_v37 = vpop.permute.xlu0 %1908 }
 0x3e0   :  { %v4511_v36 = vpop.f32.mrf.mxu1  ;;  %2372 = vmatpush1.msra.mxu0 %v2301_v16 }
 0x3e1   :  { %2373 = vmatprep.subr.mxu0 %v2300_v20  ;;  %v1924_v20 = vpop.permute.xlu1 %1923 }
 0x3e2   :  { %v4515_v48 = vpop.f32.mrf.mxu1  ;;  %2374 = vmatpush1.msra.mxu0 %v2299_v32 }
 0x3e3   :  { %2375 = vmatprep.subr.mxu0 %v2298_v56 }
 0x3e4   :  { %v4519_v12 = vpop.f32.mrf.mxu1  ;;  %2376 = vmatpush1.msra.mxu0 %v2297_v7 }
 0x3e5   :  { %2377 = vmatprep.subr.mxu0 %v2296_v49  ;;  %v1914_v56 = vpop.permute.xlu1 %1913 }
 0x3e6   :  { %v4523_v14 = vpop.f32.mrf.mxu1  ;;  %2378 = vmatpush1.msra.mxu0 %v2295_v5  ;;  %v1899_v5 = vpop.permute.xlu0 %1898 }
 0x3e7   :  { %2379 = vmatprep.subr.mxu0 %v2294_v46 }
 0x3e8   :  { %v4527_v54 = vpop.f32.mrf.mxu1  ;;  %2380 = vmatpush1.msra.mxu0 %v2293_v45 }
 0x3e9   :  { %2381 = vmatprep.subr.mxu0 %v2292_v47  ;;  %v1904_v49 = vpop.permute.xlu1 %1903 }
 0x3ea   :  { %v4531_v52 = vpop.f32.mrf.mxu1  ;;  %2382 = vmatpush1.msra.mxu0 %v2291_v13  ;;  %v1889_v13 = vpop.permute.xlu0 %1888 }
 0x3eb   :  { %2383 = vmatprep.subr.mxu0 %v2290_v53 }
 0x3ec   :  { %v4533_v55 = vpop.f32.mrf.mxu1  ;;  %2384 = vmatpush1.msra.mxu0 %v2289_v35 }
 0x3ed   :  { %2385 = vmatprep.subr.mxu0 %v2288_v31  ;;  %v1894_v41 = vpop.permute.xlu1 %1893 }
 0x3ee   :  { %v4535_v29 = vpop.f32.mrf.mxu1  ;;  %2386 = vmatpush1.msra.mxu0 %v2287_v24 }
 0x3ef   :  { %2387 = vmatprep.subr.mxu0 %v2286_v42 }
 0x3f0   :  { %v2240_v34 = vpop.f32.mrf.mxu1  ;;  %2388 = vmatpush1.msra.mxu0 %v2285_v6 }
 0x3f2   :  { %v2244_v57 = vpop.f32.mrf.mxu1 }
 0x3f4   :  { %v2246_v18 = vpop.f32.mrf.mxu1 }
 0x3f6   :  { %v2250_v61 = vpop.f32.mrf.mxu1 }
 0x3f8   :  { %v2252_v16 = vpop.f32.mrf.mxu1 }
 0x3fa   :  { %v2256_v62 = vpop.f32.mrf.mxu1 }
 0x3fb   :  { %v2257_v63 = vadd.f32 %v2256_v62, %v1904_v49  ;;  %v2239_v62 = vadd.f32 %v4535_v29, %v1889_v13 }
 0x3fc   :  { %v2258_v50 = vpop.f32.mrf.mxu1 }
 0x3fd   :  { %v2259_v42 = vadd.f32 %v2258_v50, %v1904_v49  ;;  %v2241_v50 = vadd.f32 %v2240_v34, %v1889_v13 }
 0x3fe   :  { %v2262_v32 = vpop.f32.mrf.mxu1 }
 0x3ff   :  { %v2263_v31 = vadd.f32 %v2262_v32, %v1909_v37  ;;  %v2245_v32 = vadd.f32 %v2244_v57, %v1894_v41  ;;  %v2334_v57 = vmax.f32 %v2241_v50, 0.0 }
 0x400   :  { %v2264_v4 = vpop.f32.mrf.mxu1 }
 0x401   :  { %v2265_v59 = vadd.f32 %v2264_v4, %v1909_v37  ;;  %v2247_v4 = vadd.f32 %v2246_v18, %v1894_v41  ;;  %v2339_v37 = vmax.f32 %v2257_v63, 0.0 }
 0x402   :  { %v2268_v60 = vpop.f32.mrf.mxu1 }
 0x403   :  { %v2269_v30 = vadd.f32 %v2268_v60, %v1914_v56  ;;  %v2340_v60 = vmax.f32 %v2259_v42, 0.0 }
 0x404   :  { %v2270_v7 = vpop.f32.mrf.mxu1 }
 0x405   :  { %v2271_v1 = vadd.f32 %v2270_v7, %v1914_v56  ;;  %v1879_v7 = vpop.permute.xlu0 %1878  ;;  %v2341_v56 = vmax.f32 %v2263_v31, 0.0 }
 0x406   :  { %v2274_v44 = vpop.f32.mrf.mxu1  ;;  %v2229_v63 = vadd.f32 %v4527_v54, %v1879_v7  ;;  %v2227_v34 = vadd.f32 %v4523_v14, %v1879_v7 }
 0x407   :  { %v2275_v47 = vadd.f32 %v2274_v44, %v1919_v25  ;;  %v2344_v6 = vmax.f32 %v2271_v1, 0.0  ;;  %v2251_v44 = vadd.f32 %v2250_v61, %v1899_v5 }
 0x408   :  { %v2276_v39 = vpop.f32.mrf.mxu1 }
 0x409   :  { %v2277_v23 = vadd.f32 %v2276_v39, %v1919_v25  ;;  %v2345_v24 = vmax.f32 %v2275_v47, 0.0  ;;  %v2343_v39 = vmax.f32 %v2269_v30, 0.0  ;;  %v2342_v25 = vmax.f32 %v2265_v59, 0.0  ;;  %v1869_v61 = vpop.permute.xlu0 %1868 }
 0x40a   :  { %v2280_v28 = vpop.f32.mrf.mxu1  ;;  %v2337_v49 = vmax.f32 %v2251_v44, 0.0  ;;  %v2215_v13 = vadd.f32 %v4507_v38, %v1869_v61  ;;  %v2329_v30 = vmax.f32 %v2227_v34, 0.0 }
 0x40b   :  { %v2281_v46 = vadd.f32 %v2280_v28, %v1924_v20  ;;  %v2346_v35 = vmax.f32 %v2277_v23, 0.0  ;;  %v1884_v28 = vpop.permute.xlu1 %1883  ;;  %v2336_v23 = vmax.f32 %v2247_v4, 0.0 }
 0x40c   :  { %v2282_v21 = vpop.f32.mrf.mxu1  ;;  %v2233_v18 = vadd.f32 %v4531_v52, %v1884_v28  ;;  %v2217_v52 = vadd.f32 %v4511_v36, %v1869_v61  ;;  %v1672_v61 = vmul.f32 %v4442_v10, %v4442_v10 }
 0x40d   :  { %v2283_v45 = vadd.f32 %v2282_v21, %v1924_v20  ;;  %v2347_v53 = vmax.f32 %v2281_v46, 0.0  ;;  %v2253_v20 = vadd.f32 %v2252_v16, %v1899_v5  ;;  %v2235_v16 = vadd.f32 %v4533_v55, %v1884_v28  ;;  %v1859_v54 = vpop.permute.xlu0 %1858 }
 0x40e   :  { %v2335_v5 = vmax.f32 %v2245_v32, 0.0  ;;  %v2331_v1 = vmax.f32 %v2233_v18, 0.0  ;;  %v2203_v31 = vadd.f32 %v4493_v43, %v1859_v54 }
 0x40f   :  { %v2348_v40 = vmax.f32 %v2283_v45, 0.0  ;;  %v2338_v46 = vmax.f32 %v2253_v20, 0.0  ;;  %v1874_v21 = vpop.permute.xlu1 %1873  ;;  %v2333_v45 = vmax.f32 %v2239_v62, 0.0  ;;  %v2332_v41 = vmax.f32 %v2235_v16, 0.0 }
 0x410   :  { %v2223_v29 = vadd.f32 %v4519_v12, %v1874_v21  ;;  %v2221_v47 = vadd.f32 %v4515_v48, %v1874_v21  ;;  %v2205_v48 = vadd.f32 %v4495_v11, %v1859_v54  ;;  %v2321_v20 = vmax.f32 %v2203_v31, 0.0  ;;  %v2449_v54 = vld [vmem:[%s4734_s6] sm:$0xff] }
 0x411   :  { %2389 = vmatprep.subr.mxu0 %v2348_v40  ;;  %v2330_v40 = vmax.f32 %v2229_v63, 0.0  ;;  %v1673_v16 = vmul.f32 %v4444_v26, %v4444_v26 }
 0x412   :  { %2390 = vmatpush2.msra.mxu0 %v2347_v53  ;;  %v2328_v53 = vmax.f32 %v2223_v29, 0.0  ;;  %v2327_v59 = vmax.f32 %v2221_v47, 0.0 }
 0x413   :  { %2391 = vmatprep.subr.mxu0 %v2346_v35  ;;  %v1864_v55 = vpop.permute.xlu1 %1863  ;;  %v2326_v35 = vmax.f32 %v2217_v52, 0.0  ;;  %v1674_v18 = vadd.f32 %v1673_v16, %v1672_v61  ;;  %v4842_v61 = vld [vmem:[#allocation14_spill] sm:$0xff] }
 0x414   :  { %2392 = vmatpush2.msra.mxu0 %v2345_v24  ;;  %v2211_v14 = vadd.f32 %v4503_v15, %v1864_v55  ;;  %v2209_v12 = vadd.f32 %v4499_v17, %v1864_v55  ;;  %v2325_v24 = vmax.f32 %v2215_v13, 0.0  ;;  %v1849_v15 = vpop.permute.xlu0 %1848  ;;  %v3400_v55 = vld [vmem:[%s4734_s6 + $0x8] sm:$0xff] }
 0x415   :  { %2393 = vmatprep.subr.mxu0 %v2344_v6  ;;  %v2193_v17 = vadd.f32 %v4487_v0, %v1849_v15  ;;  %v2191_v11 = vadd.f32 %v4485_v3, %v1849_v15  ;;  %v3364_v0 = vld [vmem:[%s4728_s0 + $0x8] sm:$0xff]  ;;  %v3411_v15 = vld [vmem:[%s4734_s6 + $0x18] sm:$0xff] }
 0x416   :  { %2394 = vmatpush2.msra.mxu0 %v2343_v39  ;;  %v2324_v42 = vmax.f32 %v2211_v14, 0.0  ;;  %v2323_v28 = vmax.f32 %v2209_v12, 0.0  ;;  %v2322_v39 = vmax.f32 %v2205_v48, 0.0  ;;  %v2429_v4 = vcombine.high %v3364_v0, %v3364_v0  ;;  %v4834_v14 = vld [vmem:[#allocation6_spill] sm:$0xff] }
 0x417   :  { %2395 = vmatprep.subr.mxu0 %v2342_v25  ;;  %v1854_v36 = vpop.permute.xlu1 %1853  ;;  %v2317_v7 = vmax.f32 %v2191_v11, 0.0 }
 0x418   :  { %2396 = vmatpush2.msra.mxu0 %v2341_v56  ;;  %v2199_v38 = vadd.f32 %v4491_v8, %v1854_v36  ;;  %v2197_v6 = vadd.f32 %v4489_v9, %v1854_v36  ;;  %v2318_v8 = vmax.f32 %v2193_v17, 0.0  ;;  %v2349_v9 = vld [vmem:[%s4732_s4] sm:$0xff] }
 0x419   :  { %2397 = vmatprep.subr.mxu0 %v2340_v60  ;;  %v4835_v36 = vld [vmem:[#allocation5_spill] sm:$0xff] }
 0x41a   :  { %2398 = vmatpush2.msra.mxu0 %v2339_v37  ;;  %v2320_v43 = vmax.f32 %v2199_v38, 0.0  ;;  %v2319_v25 = vmax.f32 %v2197_v6, 0.0 }
 0x41b   :  { %2399 = vmatprep.subr.mxu0 %v2338_v46  ;;  %v2355_v3 = vpop.permute.xlu1 %2354 }
 0x41c   :  { %2400 = vmatpush2.msra.mxu0 %v2337_v49 }
 0x41d   :  { %2401 = vmatprep.subr.mxu0 %v2336_v23  ;;  %v1669_v23 = vadd.f32 %v4444_v26, %v4442_v10 }
 0x41e   :  { %2402 = vmatpush2.msra.mxu0 %v2335_v5 }
 0x41f   :  { %2403 = vmatprep.subr.mxu0 %v2334_v57 }
 0x420   :  { %2404 = vmatpush2.msra.mxu0 %v2333_v45 }
 0x421   :  { %2405 = vmatprep.subr.mxu0 %v2332_v41 }
 0x422   :  { %2406 = vmatpush2.msra.mxu0 %v2331_v1 }
 0x423   :  { %2407 = vmatprep.subr.mxu0 %v2330_v40 }
 0x424   :  { %2408 = vmatpush2.msra.mxu0 %v2329_v30 }
 0x425   :  { %2409 = vmatprep.subr.mxu0 %v2328_v53 }
 0x426   :  { %2410 = vmatpush2.msra.mxu0 %v2327_v59  ;;  %v3407_v59 = vld [vmem:[%s4734_s6 + $0x10] sm:$0xff] }
 0x427   :  { %2411 = vmatprep.subr.mxu0 %v2326_v35 }
 0x428   :  { %2412 = vmatpush2.msra.mxu0 %v2325_v24  ;;  %v4836_v24 = vld [vmem:[#allocation8_spill] sm:$0xff] }
 0x429   :  { %2413 = vmatprep.subr.mxu0 %v2324_v42 }
 0x42a   :  { %2414 = vmatpush2.msra.mxu0 %v2323_v28 }
 0x42b   :  { %2415 = vmatprep.subr.mxu0 %v2322_v39  ;;  %v4837_v39 = vld [vmem:[#allocation7_spill] sm:$0xff] }
 0x42c   :  { %2416 = vmatpush2.msra.mxu0 %v2321_v20 }
 0x42d   :  { %2417 = vmatprep.subr.mxu0 %v2320_v43  ;;  %v3415_v43 = vld [vmem:[%s4734_s6 + $0x20] sm:$0xff] }
 0x42e   :  { %2418 = vmatpush2.msra.mxu0 %v2319_v25 }
 0x42f   :  { %2419 = vmatprep.subr.mxu0 %v2318_v8  ;;  %v4838_v8 = vld [vmem:[#allocation10_spill] sm:$0xff] }
 0x430   :  { %2420 = vmatpush2.msra.mxu0 %v2317_v7 }
 0x431   :  { %2422 = vmatmul.mubr.f32.vlgmr.msra.gmra.mxu0 %v2349_v9 }
 0x432   :  { %2532 = vmatprep.mubr.f32.mxu0 %v4799_v27 }
 0x4f1   :  { %v2423_v44 = vpop.f32.mrf.mxu0 }
 0x4f2   :  { %v2424_v56 = vadd.f32 %v2423_v44, %v2355_v3 }
 0x4f3   :  { %v2425_v60 = vpop.f32.mrf.mxu0 }
 0x4f4   :  { %v2431_v32 = vmul.f32 %v3364_v0, %v2424_v56  ;;  %v2435_v37 = vrot.slane %v2424_v56, 4  ;;  %v2426_v50 = vadd.f32 %v2425_v60, %v2355_v3  ;;  %v4839_v3 = vld [vmem:[#allocation9_spill] sm:$0xff] }
 0x4f6   :  { %v4561_v46 = vadd.f32 %v2435_v37, %v2431_v32  ;;  %v2432_v21 = vmul.f32 %v2429_v4, %v2426_v50  ;;  %v2436_v62 = vrot.slane %v2426_v50, 4  ;;  %v3419_v4 = vld [vmem:[%s4734_s6 + $0x28] sm:$0xff]  ;;  %v4840_v32 = vld [vmem:[#allocation12_spill] sm:$0xff] }
 0x4f8   :  { %v4563_v49 = vadd.f32 %v2436_v62, %v2432_v21  ;;  %2450 = vrot.lane.b32.xlu0 %v4561_v46, %s3483_s17  ;;  %v4841_v21 = vld [vmem:[#allocation11_spill] sm:$0xff] }
 0x4fa   :  { %2452 = vrot.lane.b32.xlu1 %v4563_v49, %s3483_s17 }
 0x4fc   :  { %2441 = vrot.lane.b32.xlu0 %v4561_v46, %s3484_s18 }
 0x4fe   :  { %2443 = vrot.lane.b32.xlu1 %v4563_v49, %s3484_s18 }
 0x500   :  { %2619 = vrot.lane.b32.xlu0 %v4561_v46, %s3485_s19 }
 0x502   :  { %2621 = vrot.lane.b32.xlu1 %v4563_v49, %s3485_s19 }
 0x504   :  { %2710 = vrot.lane.b32.xlu0 %v4561_v46, %s3486_s20 }
 0x506   :  { %2712 = vrot.lane.b32.xlu1 %v4563_v49, %s3486_s20 }
 0x508   :  { %2884 = vrot.lane.b32.xlu0 %v4561_v46, %s3487_s21 }
 0x50a   :  { %2886 = vrot.lane.b32.xlu1 %v4563_v49, %s3487_s21 }
 0x50c   :  { %2975 = vrot.lane.b32.xlu0 %v4561_v46, %s3488_s22 }
 0x50e   :  { %2977 = vrot.lane.b32.xlu1 %v4563_v49, %s3488_s22 }
 0x510   :  { %3066 = vrot.lane.b32.xlu0 %v4561_v46, %s3489_s23 }
 0x512   :  { %3068 = vrot.lane.b32.xlu1 %v4563_v49, %s3489_s23 }
 0x514   :  { %3157 = vrot.lane.b32.xlu0 %v4561_v46, %s3490_s24 }
 0x516   :  { %3159 = vrot.lane.b32.xlu1 %v4563_v49, %s3490_s24 }
 0x533   :  { %1670 = vadd.xlane.f32.xlu0 %v1669_v23 }
 0x537   :  { %1675 = vadd.xlane.f32.xlu0 %v1674_v18 }
 0x56a   :  { %v2451_v5 = vpop.permute.xlu0 %2450 }
 0x56c   :  { %v2453_v63 = vpop.permute.xlu1 %2452 }
 0x56d   :  { %v2454_v57 = vsel %vm804_vm2, %v2451_v5, %v2453_v63  ;;  %v2455_v34 = vsel %vm804_vm2, %v2453_v63, %v2451_v5 }
 0x56e   :  { %v2456_v45 = vmul.f32 %v2455_v34, %v4108_v22  ;;  %v2457_v29 = vmul.f32 %v2454_v57, %v4111_v51  ;;  %v2442_v41 = vpop.permute.xlu0 %2441  ;;  %v3457_v57 = vld [vmem:[%s4736_s8 + $0x18] ss:$0 sm:$0xff] }
 0x570   :  { %v2444_v47 = vpop.permute.xlu1 %2443  ;;  %3401 = vmatprep.subr.msk.mxu0 %vm362_vm0, %v2457_v29 }
 0x571   :  { %v2445_v1 = vsel %vm786_vm3, %v2442_v41, %v2444_v47  ;;  %v2446_v52 = vsel %vm786_vm3, %v2444_v47, %v2442_v41  ;;  %3402 = vmatpush1.msk.msra.mxu0 %vm362_vm0, %v2456_v45  ;;  %v3427_v45 = vld [vmem:[%s4734_s6 + $0x38] sm:$0xff]  ;;  %v3431_v41 = vld [vmem:[%s4734_s6 + $0x40] sm:$0xff] }
 0x572   :  { %v2447_v22 = vmul.f32 %v2446_v52, %v4119_v19  ;;  %v2448_v51 = vmul.f32 %v2445_v1, %v4124_v58  ;;  %3403 = vmatmul.mubr.msk.f32.vlgmr.msra.gmra.mxu0 %vm265_vm1, %v3400_v55  ;;  %v2620_v40 = vpop.permute.xlu0 %2619 }
 0x573   :  { %2612 = vmatprep.mubr.f32.mxu0 %v4799_v27 }
 0x574   :  { %v2622_v13 = vpop.permute.xlu1 %2621  ;;  %3404 = vmatprep.subr.msk.mxu0 %vm362_vm0, %v2448_v51 }
 0x575   :  { %v2623_v30 = vsel %vm983_vm4, %v2620_v40, %v2622_v13  ;;  %v2624_v19 = vsel %vm983_vm4, %v2622_v13, %v2620_v40  ;;  %3405 = vmatpush1.msk.msra.mxu0 %vm362_vm0, %v2447_v22 }
 0x576   :  { %v2625_v58 = vmul.f32 %v2624_v19, %v4142_v2  ;;  %v2626_v53 = vmul.f32 %v2623_v30, %v4834_v14  ;;  %3406 = vmatmul.mubr.msk.f32.vlgmr.msra.gmra.mxu0 %vm265_vm1, %v2449_v54  ;;  %v2711_v12 = vpop.permute.xlu0 %2710 }
 0x577   :  { %2701 = vmatprep.mubr.f32.mxu0 %v4799_v27 }
 0x578   :  { %v2713_v48 = vpop.permute.xlu1 %2712  ;;  %3408 = vmatprep.subr.msk.mxu0 %vm362_vm0, %v2626_v53 }
 0x579   :  { %v2714_v35 = vsel %vm1084_vm5, %v2711_v12, %v2713_v48  ;;  %v2715_v2 = vsel %vm1084_vm5, %v2713_v48, %v2711_v12  ;;  %3409 = vmatpush1.msk.msra.mxu0 %vm362_vm0, %v2625_v58 }
 0x57a   :  { %v2716_v31 = vmul.f32 %v2715_v2, %v4835_v36  ;;  %v2717_v38 = vmul.f32 %v2714_v35, %v4836_v24  ;;  %3410 = vmatmul.mubr.msk.f32.vlgmr.msra.gmra.mxu0 %vm265_vm1, %v3407_v59  ;;  %v2885_v42 = vpop.permute.xlu0 %2884 }
 0x57b   :  { %2792 = vmatprep.mubr.f32.mxu0 %v4799_v27 }
 0x57c   :  { %v2887_v6 = vpop.permute.xlu1 %2886  ;;  %3412 = vmatprep.subr.msk.mxu0 %vm362_vm0, %v2717_v38 }
 0x57d   :  { %v2889_v28 = vsel %vm1269_vm6, %v2887_v6, %v2885_v42  ;;  %3413 = vmatpush1.msk.msra.mxu0 %vm362_vm0, %v2716_v31  ;;  %v2888_v17 = vsel %vm1269_vm6, %v2885_v42, %v2887_v6 }
 0x57e   :  { %v2891_v11 = vmul.f32 %v2889_v28, %v4837_v39  ;;  %3414 = vmatmul.mubr.msk.f32.vlgmr.msra.gmra.mxu0 %vm265_vm1, %v3411_v15  ;;  %3416 = vmatprep.subr.msk.mxu0 %vm362_vm0, %v4563_v49  ;;  %v2976_v20 = vpop.permute.xlu0 %2975  ;;  %v2890_v7 = vmul.f32 %v2888_v17, %v4838_v8  ;;  %v3423_v49 = vld [vmem:[%s4734_s6 + $0x30] sm:$0xff] }
 0x57f   :  { %3417 = vmatpush1.msk.msra.mxu0 %vm362_vm0, %v4561_v46  ;;  %2875 = vmatprep.mubr.f32.mxu0 %v4799_v27 }
 0x580   :  { %v2978_v25 = vpop.permute.xlu1 %2977  ;;  %3420 = vmatprep.subr.msk.mxu0 %vm362_vm0, %v2891_v11 }
 0x581   :  { %v2980_v9 = vsel %vm1370_vm7, %v2978_v25, %v2976_v20  ;;  %v2979_v0 = vsel %vm1370_vm7, %v2976_v20, %v2978_v25 }
 0x582   :  { %v2982_v44 = vmul.f32 %v2980_v9, %v4839_v3  ;;  %3418 = vmatmul.mubr.msk.f32.vlgmr.msra.gmra.mxu0 %vm265_vm1, %v3415_v43  ;;  %v3067_v56 = vpop.permute.xlu0 %3066  ;;  %v2981_v37 = vmul.f32 %v2979_v0, %v4840_v32 }
 0x583   :  { %3421 = vmatpush1.msk.msra.mxu0 %vm362_vm0, %v2890_v7  ;;  %2966 = vmatprep.mubr.f32.mxu0 %v4799_v27 }
 0x584   :  { %v3069_v60 = vpop.permute.xlu1 %3068  ;;  %3424 = vmatprep.subr.msk.mxu0 %vm362_vm0, %v2982_v44 }
 0x585   :  { %v3071_v50 = vsel %vm1471_vm8, %v3069_v60, %v3067_v56  ;;  %v3070_v46 = vsel %vm1471_vm8, %v3067_v56, %v3069_v60 }
 0x586   :  { %v3073_v62 = vmul.f32 %v3071_v50, %v4841_v21  ;;  %3422 = vmatmul.mubr.msk.f32.vlgmr.msra.gmra.mxu0 %vm265_vm1, %v3419_v4  ;;  %v3158_v16 = vpop.permute.xlu0 %3157  ;;  %v3072_v18 = vmul.f32 %v3070_v46, %v4842_v61  ;;  %v1686_v21 = vld [vmem:[%s4735_s7] sm:$0xff]  ;;  %s3491_s7 = smov [#allocation2]  }
 0x587   :  { %3425 = vmatpush1.msk.msra.mxu0 %vm362_vm0, %v2981_v37  ;;  %3057 = vmatprep.mubr.f32.mxu0 %v4799_v27  ;;  %s3282_s15 = sshll.u32 %s3491_s7, 4  ;;  %s3283_s15 = int_to_ptr.vmem [resolvable:$true] %s3282_s15 }
 0x588   :  { %v3160_v23 = vpop.permute.xlu1 %3159  ;;  %3428 = vmatprep.subr.msk.mxu0 %vm362_vm0, %v3073_v62  ;;  %s3459_s16 = scalar_lea.vmem %s3283_s15, 512  ;;  %p3464_p1 = scmp.lt.s32.totalorder %s3283_s15, %s3283_s15 }
 0x589   :  { %v3162_v5 = vsel %vm1572_vm9, %v3160_v23, %v3158_v16  ;;  %v3161_v63 = vsel %vm1572_vm9, %v3158_v16, %v3160_v23  ;;  %p3460_p0 = scmp.ne.s32.totalorder %s3283_s15, %s3459_s16  ;;  %p3465_p2 = scmp.lt.s32.totalorder %s3459_s16, %s3459_s16 }
 0x58a   :  { %v3164_v34 = vmul.f32 %v3457_v57, %v3162_v5  ;;  %3426 = vmatmul.mubr.msk.f32.vlgmr.msra.gmra.mxu0 %vm265_vm1, %v3423_v49  ;;  %v3163_v29 = vmul.f32 %v3458_v33, %v3161_v63 }
 0x58b   :  { %3429 = vmatpush1.msk.msra.mxu0 %vm362_vm0, %v3072_v18  ;;  %3148 = vmatprep.mubr.f32.mxu0 %v4799_v27  ;;  %p3466_p3 = por %p3465_p2, %p3464_p1 }
 0x58c   :  { %3432 = vmatprep.subr.msk.mxu0 %vm362_vm0, %v3164_v34 }
 0x58d   :  { %p3467_p4 = pnand %p3466_p3, %p3460_p0 }
 0x58e   :  { %3430 = vmatmul.mubr.msk.f32.vlgmr.msra.gmra.mxu0 %vm265_vm1, %v3427_v45 }
 0x58f   :  { %3433 = vmatpush1.msk.msra.mxu0 %vm362_vm0, %v3163_v29  ;;  %3239 = vmatprep.mubr.f32.mxu0 %v4799_v27 }
 0x592   :  { %3434 = vmatmul.mubr.msk.f32.vlgmr.msra.gmra.mxu0 %vm265_vm1, %v3431_v41 }
 0x5bc   :  { %v1671_v40 = vpop.xlane.xlu0 %1670 }
 0x5bd   :  { %v1677_v13 = vmul.f32 0.00390625, %v1671_v40 }
 0x5bf   :  { %v1678_v58 = vmul.f32 %v1677_v13, %v1671_v40 }
 0x5c0   :  { %v1676_v27 = vpop.xlane.xlu0 %1675 }
 0x5c1   :  { %v1679_v35 = vsub.f32 %v1676_v27, %v1678_v58 }
 0x5c3   :  { %v1681_v15 = vmul.f32 0.003921569, %v1679_v35 }
 0x5c5   :  { %v1682_v43 = vadd.f32 1e-05, %v1681_v15 }
 0x5c7   :  { %3453 = vrsqrt.f32 %v1682_v43 }
 0x5d4   :  { %v3454_v50 = vpop.eup %3453 }
 0x5d5   :  { %v1687_v46 = vmul.f32 %v3454_v50, %v1677_v13  ;;  %v1684_v61 = vmul.f32 %v3454_v50, %v4442_v10  ;;  %v1685_v18 = vmul.f32 %v3454_v50, %v4444_v26 }
 0x5d7   :  { %v1688_v62 = vsub.f32 %v1686_v21, %v1687_v46 }
 0x632   :  { %v2534_v55 = vpop.f32.mrf.mxu0 }
 0x634   :  { %v2536_v47 = vpop.f32.mrf.mxu0 }
 0x636   :  { %v2614_v1 = vpop.f32.mrf.mxu0 }
 0x637   :  { %v2615_v53 = vadd.f32 %v2614_v1, %v2534_v55 }
 0x638   :  { %v2616_v52 = vpop.f32.mrf.mxu0 }
 0x639   :  { %v2617_v59 = vadd.f32 %v2616_v52, %v2536_v47 }
 0x63a   :  { %v2703_v22 = vpop.f32.mrf.mxu0 }
 0x63b   :  { %v2708_v48 = vadd.f32 %v2703_v22, %v2615_v53 }
 0x63c   :  { %v2705_v51 = vpop.f32.mrf.mxu0 }
 0x63d   :  { %v2709_v36 = vadd.f32 %v2705_v51, %v2617_v59 }
 0x63e   :  { %v2794_v54 = vpop.f32.mrf.mxu0 }
 0x63f   :  { %v2799_v31 = vadd.f32 %v2794_v54, %v2708_v48 }
 0x640   :  { %v2796_v30 = vpop.f32.mrf.mxu0 }
 0x641   :  { %v2800_v38 = vadd.f32 %v2796_v30, %v2709_v36 }
 0x642   :  { %v2877_v19 = vpop.f32.mrf.mxu0 }
 0x643   :  { %v2882_v42 = vadd.f32 %v2877_v19, %v2799_v31 }
 0x644   :  { %v2879_v14 = vpop.f32.mrf.mxu0 }
 0x645   :  { %v2883_v28 = vadd.f32 %v2879_v14, %v2800_v38 }
 0x646   :  { %v2968_v12 = vpop.f32.mrf.mxu0 }
 0x647   :  { %v2973_v17 = vadd.f32 %v2968_v12, %v2882_v42 }
 0x648   :  { %v2970_v2 = vpop.f32.mrf.mxu0 }
 0x649   :  { %v2974_v11 = vadd.f32 %v2970_v2, %v2883_v28 }
 0x64a   :  { %v3059_v24 = vpop.f32.mrf.mxu0 }
 0x64b   :  { %v3064_v20 = vadd.f32 %v3059_v24, %v2973_v17 }
 0x64c   :  { %v3061_v6 = vpop.f32.mrf.mxu0 }
 0x64d   :  { %v3065_v8 = vadd.f32 %v3061_v6, %v2974_v11 }
 0x64e   :  { %v3150_v39 = vpop.f32.mrf.mxu0 }
 0x64f   :  { %v3155_v7 = vadd.f32 %v3150_v39, %v3064_v20 }
 0x650   :  { %v3152_v25 = vpop.f32.mrf.mxu0 }
 0x651   :  { %v3156_v0 = vadd.f32 %v3152_v25, %v3065_v8 }
 0x652   :  { %v3241_v9 = vpop.f32.mrf.mxu0 }
 0x653   :  { %v3246_v3 = vadd.f32 %v3241_v9, %v3155_v7 }
 0x654   :  { %v3243_v44 = vpop.f32.mrf.mxu0 }
 0x655   :  { %v3247_v56 = vadd.f32 %v3243_v44, %v3156_v0  ;;  %v3251_v4 = vmul.f32 %v3246_v3, %v3246_v3 }
 0x657   :  { %v3252_v60 = vmul.f32 %v3247_v56, %v3247_v56  ;;  %v3248_v32 = vadd.f32 %v3247_v56, %v3246_v3 }
 0x659   :  { %3249 = vadd.xlane.f32.xlu1 %v3248_v32  ;;  %v3253_v37 = vadd.f32 %v3252_v60, %v3251_v4 }
 0x65b   :  { %3254 = vadd.xlane.f32.xlu0 %v3253_v37 }
 0x66a   :  { %1691 = vperm.xlu1 %3448, %v1688_v62  }
 0x6e2   :  { %v3250_v49 = vpop.xlane.xlu1 %3249 }
 0x6e3   :  { %v3256_v16 = vmul.f32 0.00390625, %v3250_v49 }
 0x6e4   :  { %v3255_v63 = vpop.xlane.xlu0 %3254 }
 0x6e5   :  { %v3257_v23 = vmul.f32 %v3256_v16, %v3250_v49 }
 0x6e6   :  { %v1692_v5 = vpop.permute.xlu1 %1691 }
 0x6e7   :  { %v1694_v57 = vadd.f32 %v1692_v5, %v1684_v61  ;;  %v1695_v34 = vadd.f32 %v1692_v5, %v1685_v18  ;;  %v3258_v45 = vsub.f32 %v3255_v63, %v3257_v23 }
 0x6e9   :  { %1696 = vst [vmem:[#allocation2] sm:$0xff] %v1694_v57  ;;  %1697 = vst [vmem:[#allocation2 + $0x8] sm:$0xff] %v1695_v34  ;;  %v3259_v33 = vmul.f32 0.003921569, %v3258_v45 }
 0x6eb   :  { %v3260_v29 = vadd.f32 1e-05, %v3259_v33 }
 0x6ed   :  { %3455 = vrsqrt.f32 %v3260_v29 }
 0x6fa   :  { %v3456_v41 = vpop.eup %3455 }
 0x6fb   :  { %v3265_v55 = vmul.f32 %v3456_v41, %v3256_v16  ;;  %v3262_v1 = vmul.f32 %v3456_v41, %v3246_v3  ;;  %v3263_v10 = vmul.f32 %v3456_v41, %v3247_v56 }
 0x6fd   :  { %v3266_v47 = vsub.f32 %v1686_v21, %v3265_v55 }
 0x6ff   :  { %3269 = vperm.xlu0 %3447, %v3266_v47  }
 0x77a   :  { %v3270_v52 = vpop.permute.xlu0 %3269 }
 0x77b   :  { %v3272_v26 = vadd.f32 %v3270_v52, %v3262_v1  ;;  %v3273_v22 = vadd.f32 %v3270_v52, %v3263_v10 }
 0x77d   :  { %3275 = vst [vmem:[#allocation2 + $0x10] sm:$0xff] %v3272_v26  ;;  %3276 = vst [vmem:[#allocation2 + $0x18] sm:$0xff] %v3273_v22 }
 0x77e   :  { %3470 = shalt.err (!%p3467_p4)
}
 0x77f   :  { %s3492_s25 = smov 256  }
 0x780   :  { %3288 = dma.vmem_to_hbm [thread:$0]  %s3283_s15, 512, %s4737_s9, [#allocation3], %s3492_s25, %s3492_s25, %s3483_s17  }
 0x781   :  { %3479 = dma.done.wait [#allocation3], 512  }
 0x782   :  { %3480 = vsyncadd [#allocation3], 4294966784 }
 0x783   :  { %3292 = vsyncpa [#allocation3], 1 }

</bundles_post_ra>
